<compile_context>
chip_gen: v7x
topology: tpu7x:2x2x1
jax: 0.10.0
libtpu: 0.0.40
codegen_flags: <defaults>
</compile_context>

<pallas_src>
import functools

import jax
import jax.numpy as jnp
from jax import lax
from jax.experimental import pallas as pl
from jax.experimental.pallas import tpu as pltpu


def _largest_divisor(n, limit, multiple=1):
    """Largest divisor of n that is <= limit and a multiple of `multiple`."""
    limit = max(1, min(limit, n))
    for cand in range(limit, 0, -1):
        if n % cand == 0 and cand % multiple == 0:
            return cand
    return n


# ---------------------------------------------------------------------------
# Stage 1: serial tanh recurrence, tt timesteps per grid step.
# ---------------------------------------------------------------------------
def rnn_recurrence_kernel(xpre_ref, whh_ref, h0_ref, y_ref, hlast_ref,
                          h_scratch, *, tt):
    t_idx = pl.program_id(1)

    # Initialize the carried hidden state at the first time-chunk of each
    # batch chunk (the time axis is innermost, so this is correct whether or
    # not the batch axis is sharded across cores).
    @pl.when(t_idx == 0)
    def _():
        h_scratch[...] = h0_ref[0]

    whh = whh_ref[...]  # resident bf16 W_hh^T, hoisted out of the unrolled loop

    def step(i, h):
        # h_t = tanh(x_t @ W_ih^T + b_ih + b_hh + h_{t-1} @ W_hh^T); the x/bias
        # part was precomputed into xpre (bf16) in the wrapper.  MXU operands
        # are bf16, accumulation and tanh are f32.
        pre = xpre_ref[i].astype(jnp.float32) + jnp.dot(
            h.astype(jnp.bfloat16), whh, preferred_element_type=jnp.float32)
        h_new = jnp.tanh(pre)
        y_ref[i] = h_new.astype(y_ref.dtype)
        return h_new

    h_final = lax.fori_loop(0, tt, step, h_scratch[...], unroll=True)
    h_scratch[...] = h_final

    # Emit the final state straight from the kernel (no wrapper-side slice).
    @pl.when(t_idx == pl.num_programs(1) - 1)
    def _():
        hlast_ref[0] = h_final


# ---------------------------------------------------------------------------
# Stage 2: output projection over all T*B rows (fully parallel grid).
# ---------------------------------------------------------------------------
def proj_kernel(y_ref, wout_ref, bout_ref, o_ref):
    o_ref[...] = (
        jnp.dot(y_ref[...], wout_ref[...], preferred_element_type=jnp.float32)
        + bout_ref[...]
    )


# ---------------------------------------------------------------------------
# Wrapper
# ---------------------------------------------------------------------------
def rnn_model_forward(tokens, state, params):
    """tokens: (batch, num_steps) int32; state: (1, batch, H) f32.

    Returns (output, new_state): output is (num_steps*batch, vocab), matching
    the PyTorch RNNModel.forward semantics.
    """
    W_ih, W_hh, b_ih, b_hh, W_out, b_out = params
    B, T = tokens.shape
    H = W_ih.shape[0]
    V = W_ih.shape[1]

    # ---- Stage 0: wrapper-side gather + folded bias (plain XLA ops) --------
    emb = W_ih.T.astype(jnp.float32)                            # (V, H)
    bias = (b_ih + b_hh).astype(jnp.float32)                    # (H,)
    x_pre = (emb[tokens.T.astype(jnp.int32)] + bias).astype(jnp.bfloat16)  # (T,B,H)

    whh_t = W_hh.T.astype(jnp.bfloat16)                         # (H, H)
    wout_t = W_out.T.astype(jnp.bfloat16)                       # (H, V)
    bout2 = b_out.reshape(1, V).astype(jnp.float32)             # (1, V)
    h0 = state.astype(jnp.float32)                              # (1, B, H)

    # ---- Stage 1: serial recurrence ----------------------------------------
    # tt: largest divisor of T up to 32 (amortizes per-grid-step overhead
    # without blowing up VMEM blocks / unrolled code size).
    tt = _largest_divisor(T, 32)
    nt = T // tt
    # Split the batch across two cores only if each half keeps bf16 sublane
    # alignment (multiple of 16).  With B=8 below this stays at 1.
    nbc = 2 if (B % 32 == 0) else 1
    Bc = B // nbc

    y, h_last = pl.pallas_call(
        functools.partial(rnn_recurrence_kernel, tt=tt),
        out_shape=(
            jax.ShapeDtypeStruct((T, B, H), jnp.bfloat16),      # hidden slab
            jax.ShapeDtypeStruct((1, B, H), jnp.float32),       # final state
        ),
        grid=(nbc, nt),
        in_specs=[
            pl.BlockSpec((tt, Bc, H), lambda c, t: (t, c, 0)),  # precomputed x
            pl.BlockSpec((H, H), lambda c, t: (0, 0)),          # W_hh^T resident
            pl.BlockSpec((1, Bc, H), lambda c, t: (0, c, 0)),   # initial state
        ],
        out_specs=(
            pl.BlockSpec((tt, Bc, H), lambda c, t: (t, c, 0)),
            pl.BlockSpec((1, Bc, H), lambda c, t: (0, c, 0)),
        ),
        scratch_shapes=[pltpu.VMEM((Bc, H), jnp.float32)],      # carried hidden
        compiler_params=pltpu.CompilerParams(
            dimension_semantics=("parallel", "arbitrary"),      # batch || , time serial
            vmem_limit_bytes=32 * 1024 * 1024,
        ),
    )(x_pre, whh_t, h0)

    # ---- Stage 2: parallel output projection --------------------------------
    rows = T * B
    y2 = y.reshape(rows, H)                                     # row = t*B + b (torch order)
    # Row tile: keep >= 2 grid steps so pipelining / megacore stay engaged.
    tm = _largest_divisor(rows, min(512, max(16, rows // 2)), multiple=16)
    # Vocab tile: keeps the resident W_out^T block bounded at large vocabs.
    tv = _largest_divisor(V, 2048, multiple=128)

    logits = pl.pallas_call(
        proj_kernel,
        out_shape=jax.ShapeDtypeStruct((rows, V), jnp.float32),
        grid=(rows // tm, V // tv),
        in_specs=[
            pl.BlockSpec((tm, H), lambda i, j: (i, 0)),         # hidden rows (bf16)
            pl.BlockSpec((H, tv), lambda i, j: (0, j)),         # W_out^T tile (bf16)
            pl.BlockSpec((1, tv), lambda i, j: (0, j)),         # bias tile (f32)
        ],
        out_specs=pl.BlockSpec((tm, tv), lambda i, j: (i, j)),  # lane-dense logits
        compiler_params=pltpu.CompilerParams(
            dimension_semantics=("parallel", "parallel"),
            vmem_limit_bytes=32 * 1024 * 1024,
        ),
    )(y2, wout_t, bout2)

    return logits, h_last


# ---------------------------------------------------------------------------
# Pure-JAX f32 reference mirroring the PyTorch module.
# ---------------------------------------------------------------------------
def reference_forward(tokens, state, params):
    W_ih, W_hh, b_ih, b_hh, W_out, b_out = params
    V = W_ih.shape[1]
    X = jax.nn.one_hot(tokens.T, V, dtype=jnp.float32)          # (T, B, V)

    def step(h, x_t):
        h_new = jnp.tanh(x_t @ W_ih.T + b_ih + h @ W_hh.T + b_hh)
        return h_new, h_new

    h_last, Y = lax.scan(step, state[0], X)                     # Y: (T, B, H)
    out = Y.reshape(-1, Y.shape[-1]) @ W_out.T + b_out
    return out, h_last[None]


if __name__ == "__main__":
    # Small but vreg-aligned shapes: B multiple of 8 (sublane), H/V multiples
    # of 128 (lane) so every block is dense and stores are unmasked.
    batch_size = 8
    num_steps = 16
    vocab_size = 128
    num_hiddens = 128

    key = jax.random.PRNGKey(0)
    k_tok, k_wih, k_whh, k_bih, k_bhh, k_wo, k_bo = jax.random.split(key, 7)

    # Deterministic parameter init (PyTorch default: U(-1/sqrt(H), 1/sqrt(H))).
    bound = 1.0 / jnp.sqrt(jnp.float32(num_hiddens))
    W_ih = jax.random.uniform(k_wih, (num_hiddens, vocab_size), jnp.float32, -bound, bound)
    W_hh = jax.random.uniform(k_whh, (num_hiddens, num_hiddens), jnp.float32, -bound, bound)
    b_ih = jax.random.uniform(k_bih, (num_hiddens,), jnp.float32, -bound, bound)
    b_hh = jax.random.uniform(k_bhh, (num_hiddens,), jnp.float32, -bound, bound)
    W_out = jax.random.uniform(k_wo, (vocab_size, num_hiddens), jnp.float32, -bound, bound)
    b_out = jax.random.uniform(k_bo, (vocab_size,), jnp.float32, -bound, bound)
    params = (W_ih, W_hh, b_ih, b_hh, W_out, b_out)

    tokens = jax.random.randint(k_tok, (batch_size, num_steps), 0, vocab_size, jnp.int32)
    state0 = jnp.zeros((1, batch_size, num_hiddens), jnp.float32)  # begin_state

    out, new_state = rnn_model_forward(tokens, state0, params)
    out = jax.block_until_ready(out)
    new_state = jax.block_until_ready(new_state)

    ref_out, ref_state = reference_forward(tokens, state0, params)
    assert out.shape == (num_steps * batch_size, vocab_size)
    assert new_state.shape == (1, batch_size, num_hiddens)
    # bf16 MXU operands (f32 accumulation) -> relaxed tolerance vs f32 reference.
    assert jnp.allclose(out, ref_out, atol=1e-2, rtol=1e-2), "output mismatch vs reference"
    assert jnp.allclose(new_state, ref_state, atol=1e-2, rtol=1e-2), "state mismatch vs reference"

    print("KERNEL_OK")
</pallas_src>

<mosaic_0001>
module attributes {stable_mosaic.version = 11 : i64} {
  func.func @rnn_recurrence_kernel(%arg0: i32, %arg1: i32, %arg2: memref<16x8x128xbf16, #tpu.memory_space<vmem>>, %arg3: memref<128x128xbf16, #tpu.memory_space<vmem>>, %arg4: memref<1x8x128xf32, #tpu.memory_space<vmem>>, %arg5: memref<16x8x128xbf16, #tpu.memory_space<vmem>>, %arg6: memref<1x8x128xf32, #tpu.memory_space<vmem>>, %arg7: memref<8x128xf32, #tpu.memory_space<vmem>>) attributes {dimension_semantics = [#tpu.dimension_semantics<parallel>, #tpu.dimension_semantics<arbitrary>], iteration_bounds = array<i64: 1, 1>, scalar_prefetch = 0 : i64, scratch_operands = 1 : i64, tpu.core_type = #tpu.core_type<tc>, window_params = [{transform_indices = @transform_0, window_bounds = array<i64: 16, 8, 128>}, {pipeline_mode = #tpu.pipeline_mode<synchronous>, transform_indices = @transform_1, window_bounds = array<i64: 128, 128>}, {transform_indices = @transform_2, window_bounds = array<i64: 1, 8, 128>}, {transform_indices = @transform_3, window_bounds = array<i64: 16, 8, 128>}, {transform_indices = @transform_4, window_bounds = array<i64: 1, 8, 128>}]} {
    %c0_i32 = arith.constant 0 : i32
    %0 = arith.cmpi eq, %arg1, %c0_i32 : i32
    %1 = arith.extui %0 : i1 to i32
    %c0_i32_0 = arith.constant 0 : i32
    %2 = arith.cmpi ne, %1, %c0_i32_0 : i32
    scf.if %2 {
      %c0_88 = arith.constant 0 : index
      %c0_89 = arith.constant 0 : index
      %c0_90 = arith.constant 0 : index
      %217 = vector.load %arg4[%c0_88, %c0_89, %c0_90] : memref<1x8x128xf32, #tpu.memory_space<vmem>>, vector<1x8x128xf32>
      %218 = vector.shape_cast %217 : vector<1x8x128xf32> to vector<8x128xf32>
      %c0_91 = arith.constant 0 : index
      %c0_92 = arith.constant 0 : index
      %219 = vector.load %arg7[%c0_91, %c0_92] : memref<8x128xf32, #tpu.memory_space<vmem>>, vector<8x128xf32>
      tpu.vector_store %arg7[%c0_91, %c0_92], %218 {strides = array<i32>} : memref<8x128xf32, #tpu.memory_space<vmem>>, vector<8x128xf32>,
    } else {
    }
    %c0 = arith.constant 0 : index
    %c0_1 = arith.constant 0 : index
    %3 = vector.load %arg3[%c0, %c0_1] : memref<128x128xbf16, #tpu.memory_space<vmem>>, vector<128x128xbf16>
    %c0_2 = arith.constant 0 : index
    %c0_3 = arith.constant 0 : index
    %4 = vector.load %arg7[%c0_2, %c0_3] : memref<8x128xf32, #tpu.memory_space<vmem>>, vector<8x128xf32>
    %c0_i32_4 = arith.constant 0 : i32
    %5 = arith.index_cast %c0_i32_4 : i32 to index
    %c0_5 = arith.constant 0 : index
    %c0_6 = arith.constant 0 : index
    %6 = vector.load %arg2[%5, %c0_5, %c0_6] : memref<16x8x128xbf16, #tpu.memory_space<vmem>>, vector<1x8x128xbf16>
    %7 = vector.shape_cast %6 : vector<1x8x128xbf16> to vector<8x128xbf16>
    %8 = arith.extf %7 : vector<8x128xbf16> to vector<8x128xf32>
    %9 = arith.truncf %4 : vector<8x128xf32> to vector<8x128xbf16>
    %cst = arith.constant dense<0.000000e+00> : vector<8x128xf32>
    %10 = tpu.matmul %9, %3, %cst {dimension_numbers = #tpu.dot_dimension_numbers<[1], [0], [0], [1], [0, 0, 1, 1], [], []>} : vector<8x128xbf16>, vector<128x128xbf16>, vector<8x128xf32> -> vector<8x128xf32>
    %11 = arith.addf %8, %10 : vector<8x128xf32>
    %12 = math.tanh %11 : vector<8x128xf32>
    %13 = arith.truncf %12 : vector<8x128xf32> to vector<8x128xbf16>
    %14 = arith.index_cast %c0_i32_4 : i32 to index
    %c0_7 = arith.constant 0 : index
    %c0_8 = arith.constant 0 : index
    %15 = vector.load %arg5[%14, %c0_7, %c0_8] : memref<16x8x128xbf16, #tpu.memory_space<vmem>>, vector<1x8x128xbf16>
    %16 = vector.shape_cast %15 : vector<1x8x128xbf16> to vector<8x128xbf16>
    %17 = vector.shape_cast %13 : vector<8x128xbf16> to vector<1x8x128xbf16>
    tpu.vector_store %arg5[%14, %c0_7, %c0_8], %17 {strides = array<i32>} : memref<16x8x128xbf16, #tpu.memory_space<vmem>>, vector<1x8x128xbf16>,
    %c1_i32 = arith.constant 1 : i32
    %18 = arith.index_cast %c1_i32 : i32 to index
    %c0_9 = arith.constant 0 : index
    %c0_10 = arith.constant 0 : index
    %19 = vector.load %arg2[%18, %c0_9, %c0_10] : memref<16x8x128xbf16, #tpu.memory_space<vmem>>, vector<1x8x128xbf16>
    %20 = vector.shape_cast %19 : vector<1x8x128xbf16> to vector<8x128xbf16>
    %21 = arith.extf %20 : vector<8x128xbf16> to vector<8x128xf32>
    %22 = arith.truncf %12 : vector<8x128xf32> to vector<8x128xbf16>
    %cst_11 = arith.constant dense<0.000000e+00> : vector<8x128xf32>
    %23 = tpu.matmul %22, %3, %cst_11 {dimension_numbers = #tpu.dot_dimension_numbers<[1], [0], [0], [1], [0, 0, 1, 1], [], []>} : vector<8x128xbf16>, vector<128x128xbf16>, vector<8x128xf32> -> vector<8x128xf32>
    %24 = arith.addf %21, %23 : vector<8x128xf32>
    %25 = math.tanh %24 : vector<8x128xf32>
    %26 = arith.truncf %25 : vector<8x128xf32> to vector<8x128xbf16>
    %27 = arith.index_cast %c1_i32 : i32 to index
    %c0_12 = arith.constant 0 : index
    %c0_13 = arith.constant 0 : index
    %28 = vector.load %arg5[%27, %c0_12, %c0_13] : memref<16x8x128xbf16, #tpu.memory_space<vmem>>, vector<1x8x128xbf16>
    %29 = vector.shape_cast %28 : vector<1x8x128xbf16> to vector<8x128xbf16>
    %30 = vector.shape_cast %26 : vector<8x128xbf16> to vector<1x8x128xbf16>
    tpu.vector_store %arg5[%27, %c0_12, %c0_13], %30 {strides = array<i32>} : memref<16x8x128xbf16, #tpu.memory_space<vmem>>, vector<1x8x128xbf16>,
    %c2_i32 = arith.constant 2 : i32
    %31 = arith.index_cast %c2_i32 : i32 to index
    %c0_14 = arith.constant 0 : index
    %c0_15 = arith.constant 0 : index
    %32 = vector.load %arg2[%31, %c0_14, %c0_15] : memref<16x8x128xbf16, #tpu.memory_space<vmem>>, vector<1x8x128xbf16>
    %33 = vector.shape_cast %32 : vector<1x8x128xbf16> to vector<8x128xbf16>
    %34 = arith.extf %33 : vector<8x128xbf16> to vector<8x128xf32>
    %35 = arith.truncf %25 : vector<8x128xf32> to vector<8x128xbf16>
    %cst_16 = arith.constant dense<0.000000e+00> : vector<8x128xf32>
    %36 = tpu.matmul %35, %3, %cst_16 {dimension_numbers = #tpu.dot_dimension_numbers<[1], [0], [0], [1], [0, 0, 1, 1], [], []>} : vector<8x128xbf16>, vector<128x128xbf16>, vector<8x128xf32> -> vector<8x128xf32>
    %37 = arith.addf %34, %36 : vector<8x128xf32>
    %38 = math.tanh %37 : vector<8x128xf32>
    %39 = arith.truncf %38 : vector<8x128xf32> to vector<8x128xbf16>
    %40 = arith.index_cast %c2_i32 : i32 to index
    %c0_17 = arith.constant 0 : index
    %c0_18 = arith.constant 0 : index
    %41 = vector.load %arg5[%40, %c0_17, %c0_18] : memref<16x8x128xbf16, #tpu.memory_space<vmem>>, vector<1x8x128xbf16>
    %42 = vector.shape_cast %41 : vector<1x8x128xbf16> to vector<8x128xbf16>
    %43 = vector.shape_cast %39 : vector<8x128xbf16> to vector<1x8x128xbf16>
    tpu.vector_store %arg5[%40, %c0_17, %c0_18], %43 {strides = array<i32>} : memref<16x8x128xbf16, #tpu.memory_space<vmem>>, vector<1x8x128xbf16>,
    %c3_i32 = arith.constant 3 : i32
    %44 = arith.index_cast %c3_i32 : i32 to index
    %c0_19 = arith.constant 0 : index
    %c0_20 = arith.constant 0 : index
    %45 = vector.load %arg2[%44, %c0_19, %c0_20] : memref<16x8x128xbf16, #tpu.memory_space<vmem>>, vector<1x8x128xbf16>
    %46 = vector.shape_cast %45 : vector<1x8x128xbf16> to vector<8x128xbf16>
    %47 = arith.extf %46 : vector<8x128xbf16> to vector<8x128xf32>
    %48 = arith.truncf %38 : vector<8x128xf32> to vector<8x128xbf16>
    %cst_21 = arith.constant dense<0.000000e+00> : vector<8x128xf32>
    %49 = tpu.matmul %48, %3, %cst_21 {dimension_numbers = #tpu.dot_dimension_numbers<[1], [0], [0], [1], [0, 0, 1, 1], [], []>} : vector<8x128xbf16>, vector<128x128xbf16>, vector<8x128xf32> -> vector<8x128xf32>
    %50 = arith.addf %47, %49 : vector<8x128xf32>
    %51 = math.tanh %50 : vector<8x128xf32>
    %52 = arith.truncf %51 : vector<8x128xf32> to vector<8x128xbf16>
    %53 = arith.index_cast %c3_i32 : i32 to index
    %c0_22 = arith.constant 0 : index
    %c0_23 = arith.constant 0 : index
    %54 = vector.load %arg5[%53, %c0_22, %c0_23] : memref<16x8x128xbf16, #tpu.memory_space<vmem>>, vector<1x8x128xbf16>
    %55 = vector.shape_cast %54 : vector<1x8x128xbf16> to vector<8x128xbf16>
    %56 = vector.shape_cast %52 : vector<8x128xbf16> to vector<1x8x128xbf16>
    tpu.vector_store %arg5[%53, %c0_22, %c0_23], %56 {strides = array<i32>} : memref<16x8x128xbf16, #tpu.memory_space<vmem>>, vector<1x8x128xbf16>,
    %c4_i32 = arith.constant 4 : i32
    %57 = arith.index_cast %c4_i32 : i32 to index
    %c0_24 = arith.constant 0 : index
    %c0_25 = arith.constant 0 : index
    %58 = vector.load %arg2[%57, %c0_24, %c0_25] : memref<16x8x128xbf16, #tpu.memory_space<vmem>>, vector<1x8x128xbf16>
    %59 = vector.shape_cast %58 : vector<1x8x128xbf16> to vector<8x128xbf16>
    %60 = arith.extf %59 : vector<8x128xbf16> to vector<8x128xf32>
    %61 = arith.truncf %51 : vector<8x128xf32> to vector<8x128xbf16>
    %cst_26 = arith.constant dense<0.000000e+00> : vector<8x128xf32>
    %62 = tpu.matmul %61, %3, %cst_26 {dimension_numbers = #tpu.dot_dimension_numbers<[1], [0], [0], [1], [0, 0, 1, 1], [], []>} : vector<8x128xbf16>, vector<128x128xbf16>, vector<8x128xf32> -> vector<8x128xf32>
    %63 = arith.addf %60, %62 : vector<8x128xf32>
    %64 = math.tanh %63 : vector<8x128xf32>
    %65 = arith.truncf %64 : vector<8x128xf32> to vector<8x128xbf16>
    %66 = arith.index_cast %c4_i32 : i32 to index
    %c0_27 = arith.constant 0 : index
    %c0_28 = arith.constant 0 : index
    %67 = vector.load %arg5[%66, %c0_27, %c0_28] : memref<16x8x128xbf16, #tpu.memory_space<vmem>>, vector<1x8x128xbf16>
    %68 = vector.shape_cast %67 : vector<1x8x128xbf16> to vector<8x128xbf16>
    %69 = vector.shape_cast %65 : vector<8x128xbf16> to vector<1x8x128xbf16>
    tpu.vector_store %arg5[%66, %c0_27, %c0_28], %69 {strides = array<i32>} : memref<16x8x128xbf16, #tpu.memory_space<vmem>>, vector<1x8x128xbf16>,
    %c5_i32 = arith.constant 5 : i32
    %70 = arith.index_cast %c5_i32 : i32 to index
    %c0_29 = arith.constant 0 : index
    %c0_30 = arith.constant 0 : index
    %71 = vector.load %arg2[%70, %c0_29, %c0_30] : memref<16x8x128xbf16, #tpu.memory_space<vmem>>, vector<1x8x128xbf16>
    %72 = vector.shape_cast %71 : vector<1x8x128xbf16> to vector<8x128xbf16>
    %73 = arith.extf %72 : vector<8x128xbf16> to vector<8x128xf32>
    %74 = arith.truncf %64 : vector<8x128xf32> to vector<8x128xbf16>
    %cst_31 = arith.constant dense<0.000000e+00> : vector<8x128xf32>
    %75 = tpu.matmul %74, %3, %cst_31 {dimension_numbers = #tpu.dot_dimension_numbers<[1], [0], [0], [1], [0, 0, 1, 1], [], []>} : vector<8x128xbf16>, vector<128x128xbf16>, vector<8x128xf32> -> vector<8x128xf32>
    %76 = arith.addf %73, %75 : vector<8x128xf32>
    %77 = math.tanh %76 : vector<8x128xf32>
    %78 = arith.truncf %77 : vector<8x128xf32> to vector<8x128xbf16>
    %79 = arith.index_cast %c5_i32 : i32 to index
    %c0_32 = arith.constant 0 : index
    %c0_33 = arith.constant 0 : index
    %80 = vector.load %arg5[%79, %c0_32, %c0_33] : memref<16x8x128xbf16, #tpu.memory_space<vmem>>, vector<1x8x128xbf16>
    %81 = vector.shape_cast %80 : vector<1x8x128xbf16> to vector<8x128xbf16>
    %82 = vector.shape_cast %78 : vector<8x128xbf16> to vector<1x8x128xbf16>
    tpu.vector_store %arg5[%79, %c0_32, %c0_33], %82 {strides = array<i32>} : memref<16x8x128xbf16, #tpu.memory_space<vmem>>, vector<1x8x128xbf16>,
    %c6_i32 = arith.constant 6 : i32
    %83 = arith.index_cast %c6_i32 : i32 to index
    %c0_34 = arith.constant 0 : index
    %c0_35 = arith.constant 0 : index
    %84 = vector.load %arg2[%83, %c0_34, %c0_35] : memref<16x8x128xbf16, #tpu.memory_space<vmem>>, vector<1x8x128xbf16>
    %85 = vector.shape_cast %84 : vector<1x8x128xbf16> to vector<8x128xbf16>
    %86 = arith.extf %85 : vector<8x128xbf16> to vector<8x128xf32>
    %87 = arith.truncf %77 : vector<8x128xf32> to vector<8x128xbf16>
    %cst_36 = arith.constant dense<0.000000e+00> : vector<8x128xf32>
    %88 = tpu.matmul %87, %3, %cst_36 {dimension_numbers = #tpu.dot_dimension_numbers<[1], [0], [0], [1], [0, 0, 1, 1], [], []>} : vector<8x128xbf16>, vector<128x128xbf16>, vector<8x128xf32> -> vector<8x128xf32>
    %89 = arith.addf %86, %88 : vector<8x128xf32>
    %90 = math.tanh %89 : vector<8x128xf32>
    %91 = arith.truncf %90 : vector<8x128xf32> to vector<8x128xbf16>
    %92 = arith.index_cast %c6_i32 : i32 to index
    %c0_37 = arith.constant 0 : index
    %c0_38 = arith.constant 0 : index
    %93 = vector.load %arg5[%92, %c0_37, %c0_38] : memref<16x8x128xbf16, #tpu.memory_space<vmem>>, vector<1x8x128xbf16>
    %94 = vector.shape_cast %93 : vector<1x8x128xbf16> to vector<8x128xbf16>
    %95 = vector.shape_cast %91 : vector<8x128xbf16> to vector<1x8x128xbf16>
    tpu.vector_store %arg5[%92, %c0_37, %c0_38], %95 {strides = array<i32>} : memref<16x8x128xbf16, #tpu.memory_space<vmem>>, vector<1x8x128xbf16>,
    %c7_i32 = arith.constant 7 : i32
    %96 = arith.index_cast %c7_i32 : i32 to index
    %c0_39 = arith.constant 0 : index
    %c0_40 = arith.constant 0 : index
    %97 = vector.load %arg2[%96, %c0_39, %c0_40] : memref<16x8x128xbf16, #tpu.memory_space<vmem>>, vector<1x8x128xbf16>
    %98 = vector.shape_cast %97 : vector<1x8x128xbf16> to vector<8x128xbf16>
    %99 = arith.extf %98 : vector<8x128xbf16> to vector<8x128xf32>
    %100 = arith.truncf %90 : vector<8x128xf32> to vector<8x128xbf16>
    %cst_41 = arith.constant dense<0.000000e+00> : vector<8x128xf32>
    %101 = tpu.matmul %100, %3, %cst_41 {dimension_numbers = #tpu.dot_dimension_numbers<[1], [0], [0], [1], [0, 0, 1, 1], [], []>} : vector<8x128xbf16>, vector<128x128xbf16>, vector<8x128xf32> -> vector<8x128xf32>
    %102 = arith.addf %99, %101 : vector<8x128xf32>
    %103 = math.tanh %102 : vector<8x128xf32>
    %104 = arith.truncf %103 : vector<8x128xf32> to vector<8x128xbf16>
    %105 = arith.index_cast %c7_i32 : i32 to index
    %c0_42 = arith.constant 0 : index
    %c0_43 = arith.constant 0 : index
    %106 = vector.load %arg5[%105, %c0_42, %c0_43] : memref<16x8x128xbf16, #tpu.memory_space<vmem>>, vector<1x8x128xbf16>
    %107 = vector.shape_cast %106 : vector<1x8x128xbf16> to vector<8x128xbf16>
    %108 = vector.shape_cast %104 : vector<8x128xbf16> to vector<1x8x128xbf16>
    tpu.vector_store %arg5[%105, %c0_42, %c0_43], %108 {strides = array<i32>} : memref<16x8x128xbf16, #tpu.memory_space<vmem>>, vector<1x8x128xbf16>,
    %c8_i32 = arith.constant 8 : i32
    %109 = arith.index_cast %c8_i32 : i32 to index
    %c0_44 = arith.constant 0 : index
    %c0_45 = arith.constant 0 : index
    %110 = vector.load %arg2[%109, %c0_44, %c0_45] : memref<16x8x128xbf16, #tpu.memory_space<vmem>>, vector<1x8x128xbf16>
    %111 = vector.shape_cast %110 : vector<1x8x128xbf16> to vector<8x128xbf16>
    %112 = arith.extf %111 : vector<8x128xbf16> to vector<8x128xf32>
    %113 = arith.truncf %103 : vector<8x128xf32> to vector<8x128xbf16>
    %cst_46 = arith.constant dense<0.000000e+00> : vector<8x128xf32>
    %114 = tpu.matmul %113, %3, %cst_46 {dimension_numbers = #tpu.dot_dimension_numbers<[1], [0], [0], [1], [0, 0, 1, 1], [], []>} : vector<8x128xbf16>, vector<128x128xbf16>, vector<8x128xf32> -> vector<8x128xf32>
    %115 = arith.addf %112, %114 : vector<8x128xf32>
    %116 = math.tanh %115 : vector<8x128xf32>
    %117 = arith.truncf %116 : vector<8x128xf32> to vector<8x128xbf16>
    %118 = arith.index_cast %c8_i32 : i32 to index
    %c0_47 = arith.constant 0 : index
    %c0_48 = arith.constant 0 : index
    %119 = vector.load %arg5[%118, %c0_47, %c0_48] : memref<16x8x128xbf16, #tpu.memory_space<vmem>>, vector<1x8x128xbf16>
    %120 = vector.shape_cast %119 : vector<1x8x128xbf16> to vector<8x128xbf16>
    %121 = vector.shape_cast %117 : vector<8x128xbf16> to vector<1x8x128xbf16>
    tpu.vector_store %arg5[%118, %c0_47, %c0_48], %121 {strides = array<i32>} : memref<16x8x128xbf16, #tpu.memory_space<vmem>>, vector<1x8x128xbf16>,
    %c9_i32 = arith.constant 9 : i32
    %122 = arith.index_cast %c9_i32 : i32 to index
    %c0_49 = arith.constant 0 : index
    %c0_50 = arith.constant 0 : index
    %123 = vector.load %arg2[%122, %c0_49, %c0_50] : memref<16x8x128xbf16, #tpu.memory_space<vmem>>, vector<1x8x128xbf16>
    %124 = vector.shape_cast %123 : vector<1x8x128xbf16> to vector<8x128xbf16>
    %125 = arith.extf %124 : vector<8x128xbf16> to vector<8x128xf32>
    %126 = arith.truncf %116 : vector<8x128xf32> to vector<8x128xbf16>
    %cst_51 = arith.constant dense<0.000000e+00> : vector<8x128xf32>
    %127 = tpu.matmul %126, %3, %cst_51 {dimension_numbers = #tpu.dot_dimension_numbers<[1], [0], [0], [1], [0, 0, 1, 1], [], []>} : vector<8x128xbf16>, vector<128x128xbf16>, vector<8x128xf32> -> vector<8x128xf32>
    %128 = arith.addf %125, %127 : vector<8x128xf32>
    %129 = math.tanh %128 : vector<8x128xf32>
    %130 = arith.truncf %129 : vector<8x128xf32> to vector<8x128xbf16>
    %131 = arith.index_cast %c9_i32 : i32 to index
    %c0_52 = arith.constant 0 : index
    %c0_53 = arith.constant 0 : index
    %132 = vector.load %arg5[%131, %c0_52, %c0_53] : memref<16x8x128xbf16, #tpu.memory_space<vmem>>, vector<1x8x128xbf16>
    %133 = vector.shape_cast %132 : vector<1x8x128xbf16> to vector<8x128xbf16>
    %134 = vector.shape_cast %130 : vector<8x128xbf16> to vector<1x8x128xbf16>
    tpu.vector_store %arg5[%131, %c0_52, %c0_53], %134 {strides = array<i32>} : memref<16x8x128xbf16, #tpu.memory_space<vmem>>, vector<1x8x128xbf16>,
    %c10_i32 = arith.constant 10 : i32
    %135 = arith.index_cast %c10_i32 : i32 to index
    %c0_54 = arith.constant 0 : index
    %c0_55 = arith.constant 0 : index
    %136 = vector.load %arg2[%135, %c0_54, %c0_55] : memref<16x8x128xbf16, #tpu.memory_space<vmem>>, vector<1x8x128xbf16>
    %137 = vector.shape_cast %136 : vector<1x8x128xbf16> to vector<8x128xbf16>
    %138 = arith.extf %137 : vector<8x128xbf16> to vector<8x128xf32>
    %139 = arith.truncf %129 : vector<8x128xf32> to vector<8x128xbf16>
    %cst_56 = arith.constant dense<0.000000e+00> : vector<8x128xf32>
    %140 = tpu.matmul %139, %3, %cst_56 {dimension_numbers = #tpu.dot_dimension_numbers<[1], [0], [0], [1], [0, 0, 1, 1], [], []>} : vector<8x128xbf16>, vector<128x128xbf16>, vector<8x128xf32> -> vector<8x128xf32>
    %141 = arith.addf %138, %140 : vector<8x128xf32>
    %142 = math.tanh %141 : vector<8x128xf32>
    %143 = arith.truncf %142 : vector<8x128xf32> to vector<8x128xbf16>
    %144 = arith.index_cast %c10_i32 : i32 to index
    %c0_57 = arith.constant 0 : index
    %c0_58 = arith.constant 0 : index
    %145 = vector.load %arg5[%144, %c0_57, %c0_58] : memref<16x8x128xbf16, #tpu.memory_space<vmem>>, vector<1x8x128xbf16>
    %146 = vector.shape_cast %145 : vector<1x8x128xbf16> to vector<8x128xbf16>
    %147 = vector.shape_cast %143 : vector<8x128xbf16> to vector<1x8x128xbf16>
    tpu.vector_store %arg5[%144, %c0_57, %c0_58], %147 {strides = array<i32>} : memref<16x8x128xbf16, #tpu.memory_space<vmem>>, vector<1x8x128xbf16>,
    %c11_i32 = arith.constant 11 : i32
    %148 = arith.index_cast %c11_i32 : i32 to index
    %c0_59 = arith.constant 0 : index
    %c0_60 = arith.constant 0 : index
    %149 = vector.load %arg2[%148, %c0_59, %c0_60] : memref<16x8x128xbf16, #tpu.memory_space<vmem>>, vector<1x8x128xbf16>
    %150 = vector.shape_cast %149 : vector<1x8x128xbf16> to vector<8x128xbf16>
    %151 = arith.extf %150 : vector<8x128xbf16> to vector<8x128xf32>
    %152 = arith.truncf %142 : vector<8x128xf32> to vector<8x128xbf16>
    %cst_61 = arith.constant dense<0.000000e+00> : vector<8x128xf32>
    %153 = tpu.matmul %152, %3, %cst_61 {dimension_numbers = #tpu.dot_dimension_numbers<[1], [0], [0], [1], [0, 0, 1, 1], [], []>} : vector<8x128xbf16>, vector<128x128xbf16>, vector<8x128xf32> -> vector<8x128xf32>
    %154 = arith.addf %151, %153 : vector<8x128xf32>
    %155 = math.tanh %154 : vector<8x128xf32>
    %156 = arith.truncf %155 : vector<8x128xf32> to vector<8x128xbf16>
    %157 = arith.index_cast %c11_i32 : i32 to index
    %c0_62 = arith.constant 0 : index
    %c0_63 = arith.constant 0 : index
    %158 = vector.load %arg5[%157, %c0_62, %c0_63] : memref<16x8x128xbf16, #tpu.memory_space<vmem>>, vector<1x8x128xbf16>
    %159 = vector.shape_cast %158 : vector<1x8x128xbf16> to vector<8x128xbf16>
    %160 = vector.shape_cast %156 : vector<8x128xbf16> to vector<1x8x128xbf16>
    tpu.vector_store %arg5[%157, %c0_62, %c0_63], %160 {strides = array<i32>} : memref<16x8x128xbf16, #tpu.memory_space<vmem>>, vector<1x8x128xbf16>,
    %c12_i32 = arith.constant 12 : i32
    %161 = arith.index_cast %c12_i32 : i32 to index
    %c0_64 = arith.constant 0 : index
    %c0_65 = arith.constant 0 : index
    %162 = vector.load %arg2[%161, %c0_64, %c0_65] : memref<16x8x128xbf16, #tpu.memory_space<vmem>>, vector<1x8x128xbf16>
    %163 = vector.shape_cast %162 : vector<1x8x128xbf16> to vector<8x128xbf16>
    %164 = arith.extf %163 : vector<8x128xbf16> to vector<8x128xf32>
    %165 = arith.truncf %155 : vector<8x128xf32> to vector<8x128xbf16>
    %cst_66 = arith.constant dense<0.000000e+00> : vector<8x128xf32>
    %166 = tpu.matmul %165, %3, %cst_66 {dimension_numbers = #tpu.dot_dimension_numbers<[1], [0], [0], [1], [0, 0, 1, 1], [], []>} : vector<8x128xbf16>, vector<128x128xbf16>, vector<8x128xf32> -> vector<8x128xf32>
    %167 = arith.addf %164, %166 : vector<8x128xf32>
    %168 = math.tanh %167 : vector<8x128xf32>
    %169 = arith.truncf %168 : vector<8x128xf32> to vector<8x128xbf16>
    %170 = arith.index_cast %c12_i32 : i32 to index
    %c0_67 = arith.constant 0 : index
    %c0_68 = arith.constant 0 : index
    %171 = vector.load %arg5[%170, %c0_67, %c0_68] : memref<16x8x128xbf16, #tpu.memory_space<vmem>>, vector<1x8x128xbf16>
    %172 = vector.shape_cast %171 : vector<1x8x128xbf16> to vector<8x128xbf16>
    %173 = vector.shape_cast %169 : vector<8x128xbf16> to vector<1x8x128xbf16>
    tpu.vector_store %arg5[%170, %c0_67, %c0_68], %173 {strides = array<i32>} : memref<16x8x128xbf16, #tpu.memory_space<vmem>>, vector<1x8x128xbf16>,
    %c13_i32 = arith.constant 13 : i32
    %174 = arith.index_cast %c13_i32 : i32 to index
    %c0_69 = arith.constant 0 : index
    %c0_70 = arith.constant 0 : index
    %175 = vector.load %arg2[%174, %c0_69, %c0_70] : memref<16x8x128xbf16, #tpu.memory_space<vmem>>, vector<1x8x128xbf16>
    %176 = vector.shape_cast %175 : vector<1x8x128xbf16> to vector<8x128xbf16>
    %177 = arith.extf %176 : vector<8x128xbf16> to vector<8x128xf32>
    %178 = arith.truncf %168 : vector<8x128xf32> to vector<8x128xbf16>
    %cst_71 = arith.constant dense<0.000000e+00> : vector<8x128xf32>
    %179 = tpu.matmul %178, %3, %cst_71 {dimension_numbers = #tpu.dot_dimension_numbers<[1], [0], [0], [1], [0, 0, 1, 1], [], []>} : vector<8x128xbf16>, vector<128x128xbf16>, vector<8x128xf32> -> vector<8x128xf32>
    %180 = arith.addf %177, %179 : vector<8x128xf32>
    %181 = math.tanh %180 : vector<8x128xf32>
    %182 = arith.truncf %181 : vector<8x128xf32> to vector<8x128xbf16>
    %183 = arith.index_cast %c13_i32 : i32 to index
    %c0_72 = arith.constant 0 : index
    %c0_73 = arith.constant 0 : index
    %184 = vector.load %arg5[%183, %c0_72, %c0_73] : memref<16x8x128xbf16, #tpu.memory_space<vmem>>, vector<1x8x128xbf16>
    %185 = vector.shape_cast %184 : vector<1x8x128xbf16> to vector<8x128xbf16>
    %186 = vector.shape_cast %182 : vector<8x128xbf16> to vector<1x8x128xbf16>
    tpu.vector_store %arg5[%183, %c0_72, %c0_73], %186 {strides = array<i32>} : memref<16x8x128xbf16, #tpu.memory_space<vmem>>, vector<1x8x128xbf16>,
    %c14_i32 = arith.constant 14 : i32
    %187 = arith.index_cast %c14_i32 : i32 to index
    %c0_74 = arith.constant 0 : index
    %c0_75 = arith.constant 0 : index
    %188 = vector.load %arg2[%187, %c0_74, %c0_75] : memref<16x8x128xbf16, #tpu.memory_space<vmem>>, vector<1x8x128xbf16>
    %189 = vector.shape_cast %188 : vector<1x8x128xbf16> to vector<8x128xbf16>
    %190 = arith.extf %189 : vector<8x128xbf16> to vector<8x128xf32>
    %191 = arith.truncf %181 : vector<8x128xf32> to vector<8x128xbf16>
    %cst_76 = arith.constant dense<0.000000e+00> : vector<8x128xf32>
    %192 = tpu.matmul %191, %3, %cst_76 {dimension_numbers = #tpu.dot_dimension_numbers<[1], [0], [0], [1], [0, 0, 1, 1], [], []>} : vector<8x128xbf16>, vector<128x128xbf16>, vector<8x128xf32> -> vector<8x128xf32>
    %193 = arith.addf %190, %192 : vector<8x128xf32>
    %194 = math.tanh %193 : vector<8x128xf32>
    %195 = arith.truncf %194 : vector<8x128xf32> to vector<8x128xbf16>
    %196 = arith.index_cast %c14_i32 : i32 to index
    %c0_77 = arith.constant 0 : index
    %c0_78 = arith.constant 0 : index
    %197 = vector.load %arg5[%196, %c0_77, %c0_78] : memref<16x8x128xbf16, #tpu.memory_space<vmem>>, vector<1x8x128xbf16>
    %198 = vector.shape_cast %197 : vector<1x8x128xbf16> to vector<8x128xbf16>
    %199 = vector.shape_cast %195 : vector<8x128xbf16> to vector<1x8x128xbf16>
    tpu.vector_store %arg5[%196, %c0_77, %c0_78], %199 {strides = array<i32>} : memref<16x8x128xbf16, #tpu.memory_space<vmem>>, vector<1x8x128xbf16>,
    %c15_i32 = arith.constant 15 : i32
    %200 = arith.index_cast %c15_i32 : i32 to index
    %c0_79 = arith.constant 0 : index
    %c0_80 = arith.constant 0 : index
    %201 = vector.load %arg2[%200, %c0_79, %c0_80] : memref<16x8x128xbf16, #tpu.memory_space<vmem>>, vector<1x8x128xbf16>
    %202 = vector.shape_cast %201 : vector<1x8x128xbf16> to vector<8x128xbf16>
    %203 = arith.extf %202 : vector<8x128xbf16> to vector<8x128xf32>
    %204 = arith.truncf %194 : vector<8x128xf32> to vector<8x128xbf16>
    %cst_81 = arith.constant dense<0.000000e+00> : vector<8x128xf32>
    %205 = tpu.matmul %204, %3, %cst_81 {dimension_numbers = #tpu.dot_dimension_numbers<[1], [0], [0], [1], [0, 0, 1, 1], [], []>} : vector<8x128xbf16>, vector<128x128xbf16>, vector<8x128xf32> -> vector<8x128xf32>
    %206 = arith.addf %203, %205 : vector<8x128xf32>
    %207 = math.tanh %206 : vector<8x128xf32>
    %208 = arith.truncf %207 : vector<8x128xf32> to vector<8x128xbf16>
    %209 = arith.index_cast %c15_i32 : i32 to index
    %c0_82 = arith.constant 0 : index
    %c0_83 = arith.constant 0 : index
    %210 = vector.load %arg5[%209, %c0_82, %c0_83] : memref<16x8x128xbf16, #tpu.memory_space<vmem>>, vector<1x8x128xbf16>
    %211 = vector.shape_cast %210 : vector<1x8x128xbf16> to vector<8x128xbf16>
    %212 = vector.shape_cast %208 : vector<8x128xbf16> to vector<1x8x128xbf16>
    tpu.vector_store %arg5[%209, %c0_82, %c0_83], %212 {strides = array<i32>} : memref<16x8x128xbf16, #tpu.memory_space<vmem>>, vector<1x8x128xbf16>,
    %c16_i32 = arith.constant 16 : i32
    %c0_84 = arith.constant 0 : index
    %c0_85 = arith.constant 0 : index
    %213 = vector.load %arg7[%c0_84, %c0_85] : memref<8x128xf32, #tpu.memory_space<vmem>>, vector<8x128xf32>
    tpu.vector_store %arg7[%c0_84, %c0_85], %207 {strides = array<i32>} : memref<8x128xf32, #tpu.memory_space<vmem>>, vector<8x128xf32>,
    %c0_i32_86 = arith.constant 0 : i32
    %214 = arith.cmpi eq, %arg1, %c0_i32_86 : i32
    %215 = arith.extui %214 : i1 to i32
    %c0_i32_87 = arith.constant 0 : i32
    %216 = arith.cmpi ne, %215, %c0_i32_87 : i32
    scf.if %216 {
      %c0_88 = arith.constant 0 : index
      %c0_89 = arith.constant 0 : index
      %c0_90 = arith.constant 0 : index
      %217 = vector.load %arg6[%c0_88, %c0_89, %c0_90] : memref<1x8x128xf32, #tpu.memory_space<vmem>>, vector<1x8x128xf32>
      %218 = vector.shape_cast %217 : vector<1x8x128xf32> to vector<8x128xf32>
      %219 = vector.shape_cast %207 : vector<8x128xf32> to vector<1x8x128xf32>
      tpu.vector_store %arg6[%c0_88, %c0_89, %c0_90], %219 {strides = array<i32>} : memref<1x8x128xf32, #tpu.memory_space<vmem>>, vector<1x8x128xf32>,
    } else {
    }
    return
  }
  func.func @transform_0(%arg0: i32, %arg1: i32) -> (i32, i32, i32) {
    %c0_i32 = arith.constant 0 : i32
    %c0_i32_0 = arith.constant 0 : i32
    return %arg1, %arg0, %c0_i32 : i32, i32, i32
  }
  func.func @transform_1(%arg0: i32, %arg1: i32) -> (i32, i32) {
    %c0_i32 = arith.constant 0 : i32
    %c0_i32_0 = arith.constant 0 : i32
    %c0_i32_1 = arith.constant 0 : i32
    return %c0_i32, %c0_i32_0 : i32, i32
  }
  func.func @transform_2(%arg0: i32, %arg1: i32) -> (i32, i32, i32) {
    %c0_i32 = arith.constant 0 : i32
    %c0_i32_0 = arith.constant 0 : i32
    %c0_i32_1 = arith.constant 0 : i32
    return %c0_i32, %arg0, %c0_i32_0 : i32, i32, i32
  }
  func.func @transform_3(%arg0: i32, %arg1: i32) -> (i32, i32, i32) {
    %c0_i32 = arith.constant 0 : i32
    %c0_i32_0 = arith.constant 0 : i32
    return %arg1, %arg0, %c0_i32 : i32, i32, i32
  }
  func.func @transform_4(%arg0: i32, %arg1: i32) -> (i32, i32, i32) {
    %c0_i32 = arith.constant 0 : i32
    %c0_i32_0 = arith.constant 0 : i32
    %c0_i32_1 = arith.constant 0 : i32
    return %c0_i32, %arg0, %c0_i32_0 : i32, i32, i32
  }
}

</mosaic_0001>

<bundles_post_ra>
// kernel: tpu_custom_call.1
= control target key start
LH: loop header
LB: loop body
LE: loop exit
PB: predicated region body
PF: predicated region fallthrough
CT: control target
= control target key end

     0   :  { %10 = vsyncpa [#allocation4], 0  ;;  %s1993_s0 = inlined_call_operand.hbm [shape: bf16[16,8,128], index: 0, kind: input, shape index: {}]   ;;  %s1994_s1 = inlined_call_operand.hbm [shape: bf16[128,128], index: 1, kind: input, shape index: {}]   ;;  %s1995_s2 = inlined_call_operand.hbm [shape: f32[1,8,128], index: 2, kind: input, shape index: {}]   ;;  %s1996_s3 = inlined_call_operand.hbm [shape: bf16[16,8,128], index: 3, kind: output, shape index: {0}]   ;;  %s1997_s4 = inlined_call_operand.hbm [shape: f32[1,8,128], index: 4, kind: output, shape index: {1}]  }
   0x1   :  { %11 = vsyncpa [#allocation7], 0 }
   0x2   :  { %12 = vsyncpa [#allocation5], 0 }
   0x3   :  { %13 = vsyncpa [#allocation11], 0  ;;  %s1572_s15 = smov [#allocation6]   ;;  %s1573_s17 = smov [#allocation3]  }
   0x4   :  { %s31_s16 = sshll.u32 %s1572_s15, 4  ;;  %s19_s18 = sshll.u32 %s1573_s17, 4  ;;  %s32_s16 = int_to_ptr.vmem [resolvable:$true] %s31_s16  ;;  %s1606_s18 = int_to_ptr.vmem [resolvable:$true] %s19_s18 }
   0x5   :  { %s1454_s21 = scalar_lea.hbm %s1994_s1, 1024 }
   0x6   :  { %p1455_p0 = scmp.ne.s32.totalorder %s1994_s1, %s1454_s21  ;;  %p1458_p1 = scmp.lt.u32.totalorder %s1454_s21, %s1994_s1 }
   0x8   :  { %p1460_p2 = pnand %p1458_p1, %p1455_p0 }
   0xa   :  { %1463 = shalt.err (!%p1460_p2)
}
   0xb   :  { %s1464_s26 = scalar_lea.vmem %s32_s16, 1024  ;;  %p1469_p4 = scmp.lt.s32.totalorder %s32_s16, %s32_s16 }
   0xc   :  { %p1465_p3 = scmp.ne.s32.totalorder %s32_s16, %s1464_s26  ;;  %p1470_p5 = scmp.lt.s32.totalorder %s1464_s26, %s1464_s26 }
   0xe   :  { %p1471_p6 = por %p1470_p5, %p1469_p4 }
  0x10   :  { %p1472_p7 = pnand %p1471_p6, %p1465_p3 }
  0x12   :  { %1475 = shalt.err (!%p1472_p7)
}
  0x13   :  { %s1574_s27 = smov 64   ;;  %s1575_s28 = smov 4  }
  0x14   :  { %37 = dma.hbm_to_vmem [thread:$0]  %s1994_s1, 1024, %s32_s16, [#allocation7], %s1574_s27, %s1574_s27, %s1575_s28  }
  0x15   :  { %s1476_s7 = scalar_lea.hbm %s1993_s0, 1024 }
  0x16   :  { %p1477_p8 = scmp.ne.s32.totalorder %s1993_s0, %s1476_s7  ;;  %p1480_p9 = scmp.lt.u32.totalorder %s1476_s7, %s1993_s0 }
  0x18   :  { %p1482_p10 = pnand %p1480_p9, %p1477_p8 }
  0x1a   :  { %1485 = shalt.err (!%p1482_p10)
}
  0x1b   :  { %s1486_s12 = scalar_lea.vmem %s1606_s18, 1024  ;;  %p1491_p12 = scmp.lt.s32.totalorder %s1606_s18, %s1606_s18 }
  0x1c   :  { %p1487_p11 = scmp.ne.s32.totalorder %s1606_s18, %s1486_s12  ;;  %p1492_p13 = scmp.lt.s32.totalorder %s1486_s12, %s1486_s12 }
  0x1e   :  { %p1493_p0 = por %p1492_p13, %p1491_p12 }
  0x20   :  { %p1494_p1 = pnand %p1493_p0, %p1487_p11 }
  0x22   :  { %1497 = shalt.err (!%p1494_p1)
}
  0x23   :  { %25 = dma.hbm_to_vmem [thread:$0]  %s1993_s0, 1024, %s1606_s18, [#allocation4], %s1574_s27, %s1574_s27, %s1575_s28  }
  0x24   :  { %s1576_s14 = smov [#allocation8]   ;;  %s1498_s19 = scalar_lea.hbm %s1995_s2, 128 }
  0x25   :  { %s44_s15 = sshll.u32 %s1576_s14, 4  ;;  %p1499_p2 = scmp.ne.s32.totalorder %s1995_s2, %s1498_s19  ;;  %s45_s15 = int_to_ptr.vmem [resolvable:$true] %s44_s15 }
  0x26   :  { %p1502_p3 = scmp.lt.u32.totalorder %s1498_s19, %s1995_s2 }
  0x28   :  { %p1504_p4 = pnand %p1502_p3, %p1499_p2 }
  0x2a   :  { %1507 = shalt.err (!%p1504_p4)
}
  0x2b   :  { %s1508_s24 = scalar_lea.vmem %s45_s15, 128  ;;  %p1513_p6 = scmp.lt.s32.totalorder %s45_s15, %s45_s15 }
  0x2c   :  { %p1509_p5 = scmp.ne.s32.totalorder %s45_s15, %s1508_s24  ;;  %p1514_p7 = scmp.lt.s32.totalorder %s1508_s24, %s1508_s24 }
  0x2e   :  { %p1515_p8 = por %p1514_p7, %p1513_p6 }
  0x30   :  { %p1516_p9 = pnand %p1515_p8, %p1509_p5 }
  0x32   :  { %1519 = shalt.err (!%p1516_p9)
}
  0x33   :  { %47 = dma.hbm_to_vmem [thread:$0]  %s1995_s2, 128, %s45_s15, [#allocation7]  }
  0x34   :  { %1564 = dma.done.wait [#allocation4], 1024  }
  0x35   :  { %1565 = vsyncadd [#allocation4], 4294966272 }
  0x36   :  { %1566 = dma.done.wait [#allocation7], 1152  }
  0x37   :  { %1567 = vsyncadd [#allocation7], 4294966144  ;;  %v1577_v0 = vmov 0.0   ;;  %vm1578_vm0 = vmmov 0   ;;  %v1661_v1 = vld [vmem:[#allocation6] sm:$0xff]   ;;  %v1664_v2 = vld [vmem:[#allocation6 + $0x8] sm:$0xff]  }
  0x38   :  { %1085 = vmatprep.subr.bf16.mxu0 %v1577_v0  ;;  %1101 = vmatprep.mubr.msk.bf16.mxu0 %vm1578_vm0, %v1577_v0  ;;  %v1670_v3 = vld [vmem:[#allocation6 + $0x10] sm:$0xff]   ;;  %v1676_v4 = vld [vmem:[#allocation6 + $0x18] sm:$0xff]   ;;  %v1682_v5 = vld [vmem:[#allocation6 + $0x20] sm:$0xff]   ;;  %s1579_s2 = smov [#allocation10]   ;;  %s1580_s26 = smov [#allocation9]  }
  0x39   :  { %1105 = vmatprep.subr.bf16.mxu1 %v1577_v0  ;;  %1121 = vmatprep.mubr.msk.bf16.mxu1 %vm1578_vm0, %v1577_v0  ;;  %v1688_v6 = vld [vmem:[#allocation6 + $0x28] sm:$0xff]   ;;  %v1694_v7 = vld [vmem:[#allocation6 + $0x30] sm:$0xff]   ;;  %v1700_v8 = vld [vmem:[#allocation6 + $0x38] sm:$0xff]   ;;  %s919_s25 = sshll.u32 %s1579_s2, 4  ;;  %s906_s29 = sshll.u32 %s1580_s26, 4  ;;  %s920_s25 = int_to_ptr.vmem [resolvable:$true] %s919_s25  ;;  %s1959_s29 = int_to_ptr.vmem [resolvable:$true] %s906_s29 }
  0x3a   :  { %1086 = vmatpush3.bf16.msra.mxu0 %v1661_v1  ;;  %1106 = vmatpush3.bf16.msra.mxu1 %v1661_v1  ;;  %v62_v9 = vld [vmem:[#allocation8] sm:$0xff]  ;;  %v225_v28 = vld [vmem:[#allocation3 + $0x8] sm:$0xff]   ;;  %v321_v45 = vld [vmem:[#allocation3 + $0x10] sm:$0xff]   ;;  %s1520_s30 = scalar_lea.vmem %s920_s25, 128  ;;  %p1525_p11 = scmp.lt.s32.totalorder %s920_s25, %s920_s25 }
  0x3b   :  { %1087 = vmatprep.subr.bf16.mxu0 %v1577_v0  ;;  %1107 = vmatprep.subr.bf16.mxu1 %v1577_v0  ;;  %v83_v10 = vpack.c.bf16 %v62_v9, %v62_v9  ;;  %v81_v11 = vld [vmem:[#allocation3] sm:$0xff]   ;;  %v226_v29 = vunpack.c.l.bf16 %v225_v28  ;;  %v274_v37 = vunpack.c.h.bf16 %v225_v28  ;;  %v322_v46 = vunpack.c.l.bf16 %v321_v45  ;;  %v417_v62 = vld [vmem:[#allocation3 + $0x18] sm:$0xff]   ;;  %p1521_p10 = scmp.ne.s32.totalorder %s920_s25, %s1520_s30  ;;  %p1526_p12 = scmp.lt.s32.totalorder %s1520_s30, %s1520_s30 }
  0x3c   :  { %v82_v12 = vunpack.c.l.bf16 %v81_v11  ;;  %v178_v20 = vunpack.c.h.bf16 %v81_v11  ;;  %v370_v54 = vunpack.c.h.bf16 %v321_v45  ;;  %v418_v63 = vunpack.c.l.bf16 %v417_v62 }
  0x3d   :  { %p1527_p13 = por %p1526_p12, %p1525_p11 }
  0x3e   :  { %1088 = vmatpush3.bf16.msra.mxu0 %v1664_v2  ;;  %1108 = vmatpush3.bf16.msra.mxu1 %v1664_v2 }
  0x3f   :  { %1089 = vmatprep.subr.bf16.mxu0 %v1577_v0  ;;  %1109 = vmatprep.subr.bf16.mxu1 %v1577_v0  ;;  %p1528_p0 = pnand %p1527_p13, %p1521_p10 }
  0x42   :  { %1090 = vmatpush3.bf16.msra.mxu0 %v1670_v3  ;;  %1110 = vmatpush3.bf16.msra.mxu1 %v1670_v3 }
  0x43   :  { %1091 = vmatprep.subr.bf16.mxu0 %v1577_v0  ;;  %1111 = vmatprep.subr.bf16.mxu1 %v1577_v0 }
  0x46   :  { %1092 = vmatpush3.bf16.msra.mxu0 %v1676_v4  ;;  %1112 = vmatpush3.bf16.msra.mxu1 %v1676_v4 }
  0x47   :  { %1093 = vmatprep.subr.bf16.mxu0 %v1577_v0  ;;  %1113 = vmatprep.subr.bf16.mxu1 %v1577_v0 }
  0x4a   :  { %1094 = vmatpush3.bf16.msra.mxu0 %v1682_v5  ;;  %1114 = vmatpush3.bf16.msra.mxu1 %v1682_v5 }
  0x4b   :  { %1095 = vmatprep.subr.bf16.mxu0 %v1577_v0  ;;  %1115 = vmatprep.subr.bf16.mxu1 %v1577_v0 }
  0x4e   :  { %1096 = vmatpush3.bf16.msra.mxu0 %v1688_v6  ;;  %1116 = vmatpush3.bf16.msra.mxu1 %v1688_v6 }
  0x4f   :  { %1097 = vmatprep.subr.bf16.mxu0 %v1577_v0  ;;  %1117 = vmatprep.subr.bf16.mxu1 %v1577_v0 }
  0x52   :  { %1098 = vmatpush3.bf16.msra.mxu0 %v1694_v7  ;;  %1118 = vmatpush3.bf16.msra.mxu1 %v1694_v7 }
  0x53   :  { %1099 = vmatprep.subr.bf16.mxu0 %v1577_v0  ;;  %1119 = vmatprep.subr.bf16.mxu1 %v1577_v0 }
  0x56   :  { %1100 = vmatpush3.bf16.msra.mxu0 %v1700_v8  ;;  %1120 = vmatpush3.bf16.msra.mxu1 %v1700_v8 }
  0x57   :  { %1125 = vmatprep.subr.bf16.mxu0 %v1577_v0  ;;  %1145 = vmatprep.subr.bf16.mxu1 %v1577_v0 }
  0x59   :  { %1102 = vmatmul.mubr.bf16.vlgmr.msra.gmra.mrb[0].mxu0 %v83_v10 }
  0x5a   :  { %1126 = vmatpush3.bf16.msra.mxu0 %v1661_v1  ;;  %1141 = vmatprep.mubr.msk.bf16.mxu0 %vm1578_vm0, %v1577_v0 }
  0x5b   :  { %1127 = vmatprep.subr.bf16.mxu0 %v1577_v0 }
  0x5e   :  { %1128 = vmatpush3.bf16.msra.mxu0 %v1664_v2 }
  0x5f   :  { %1129 = vmatprep.subr.bf16.mxu0 %v1577_v0 }
  0x62   :  { %1130 = vmatpush3.bf16.msra.mxu0 %v1670_v3 }
  0x63   :  { %1131 = vmatprep.subr.bf16.mxu0 %v1577_v0 }
  0x66   :  { %1132 = vmatpush3.bf16.msra.mxu0 %v1676_v4 }
  0x67   :  { %1133 = vmatprep.subr.bf16.mxu0 %v1577_v0 }
  0x6a   :  { %1134 = vmatpush3.bf16.msra.mxu0 %v1682_v5 }
  0x6b   :  { %1135 = vmatprep.subr.bf16.mxu0 %v1577_v0 }
  0x6e   :  { %1136 = vmatpush3.bf16.msra.mxu0 %v1688_v6 }
  0x6f   :  { %1137 = vmatprep.subr.bf16.mxu0 %v1577_v0 }
  0x72   :  { %1138 = vmatpush3.bf16.msra.mxu0 %v1694_v7 }
  0x73   :  { %1139 = vmatprep.subr.bf16.mxu0 %v1577_v0 }
  0x76   :  { %1140 = vmatpush3.bf16.msra.mxu0 %v1700_v8 }
  0x77   :  { %1165 = vmatprep.subr.bf16.mxu0 %v1577_v0 }
 0x12c   :  { %v166_v13 = vpop.f32.mrb[0].mxu0 }
 0x12d   :  { %v172_v14 = vadd.f32 %v166_v13, %v82_v12  ;;  %v1103_v15 = vpop.f32.mrb[1].mxu0 }
 0x12e   :  { %v169_v16 = vpop.f32.mrb[2].mxu0 }
 0x12f   :  { %1422 = vtanh.f32 %v172_v14  ;;  %v1104_v17 = vpop.f32.mrb[3].mxu0  ;;  %v466_v16 = vunpack.c.h.bf16 %v417_v62 }
 0x139   :  { %v1423_v18 = vpop.eup %1422 }
 0x13a   :  { %v174_v19 = vpack.c.bf16 %v1423_v18, %v1423_v18 }
 0x13c   :  { %175 = vst [vmem:[#allocation9] sm:$0xf] %v174_v19  ;;  %1122 = vmatmul.mubr.bf16.vlgmr.msra.gmra.mrb[0].mxu1 %v174_v19 }
 0x13d   :  { %1146 = vmatpush3.bf16.msra.mxu1 %v1661_v1  ;;  %1161 = vmatprep.mubr.msk.bf16.mxu1 %vm1578_vm0, %v1577_v0 }
 0x13e   :  { %1147 = vmatprep.subr.bf16.mxu1 %v1577_v0 }
 0x141   :  { %1148 = vmatpush3.bf16.msra.mxu1 %v1664_v2 }
 0x142   :  { %1149 = vmatprep.subr.bf16.mxu1 %v1577_v0 }
 0x145   :  { %1150 = vmatpush3.bf16.msra.mxu1 %v1670_v3 }
 0x146   :  { %1151 = vmatprep.subr.bf16.mxu1 %v1577_v0 }
 0x149   :  { %1152 = vmatpush3.bf16.msra.mxu1 %v1676_v4 }
 0x14a   :  { %1153 = vmatprep.subr.bf16.mxu1 %v1577_v0 }
 0x14d   :  { %1154 = vmatpush3.bf16.msra.mxu1 %v1682_v5 }
 0x14e   :  { %1155 = vmatprep.subr.bf16.mxu1 %v1577_v0 }
 0x151   :  { %1156 = vmatpush3.bf16.msra.mxu1 %v1688_v6 }
 0x152   :  { %1157 = vmatprep.subr.bf16.mxu1 %v1577_v0 }
 0x155   :  { %1158 = vmatpush3.bf16.msra.mxu1 %v1694_v7 }
 0x156   :  { %1159 = vmatprep.subr.bf16.mxu1 %v1577_v0 }
 0x159   :  { %1160 = vmatpush3.bf16.msra.mxu1 %v1700_v8 }
 0x15a   :  { %1185 = vmatprep.subr.bf16.mxu1 %v1577_v0 }
 0x20f   :  { %v213_v21 = vpop.f32.mrb[0].mxu1 }
 0x210   :  { %v219_v22 = vadd.f32 %v213_v21, %v178_v20  ;;  %v1123_v23 = vpop.f32.mrb[1].mxu1 }
 0x211   :  { %v216_v24 = vpop.f32.mrb[2].mxu1 }
 0x212   :  { %1424 = vtanh.f32 %v219_v22  ;;  %v1124_v25 = vpop.f32.mrb[3].mxu1  ;;  %v513_v24 = vld [vmem:[#allocation3 + $0x20] sm:$0xff]  }
 0x213   :  { %v514_v25 = vunpack.c.l.bf16 %v513_v24 }
 0x21c   :  { %v1425_v26 = vpop.eup %1424 }
 0x21d   :  { %v221_v27 = vpack.c.bf16 %v1425_v26, %v1425_v26 }
 0x21f   :  { %223 = vst [vmem:[#allocation9 + $0x4] sm:$0xf] %v221_v27  ;;  %1142 = vmatmul.mubr.bf16.vlgmr.msra.gmra.mrb[4].mxu0 %v221_v27 }
 0x220   :  { %1166 = vmatpush3.bf16.msra.mxu0 %v1661_v1  ;;  %1181 = vmatprep.mubr.msk.bf16.mxu0 %vm1578_vm0, %v1577_v0 }
 0x221   :  { %1167 = vmatprep.subr.bf16.mxu0 %v1577_v0 }
 0x224   :  { %1168 = vmatpush3.bf16.msra.mxu0 %v1664_v2 }
 0x225   :  { %1169 = vmatprep.subr.bf16.mxu0 %v1577_v0 }
 0x228   :  { %1170 = vmatpush3.bf16.msra.mxu0 %v1670_v3 }
 0x229   :  { %1171 = vmatprep.subr.bf16.mxu0 %v1577_v0 }
 0x22c   :  { %1172 = vmatpush3.bf16.msra.mxu0 %v1676_v4 }
 0x22d   :  { %1173 = vmatprep.subr.bf16.mxu0 %v1577_v0 }
 0x230   :  { %1174 = vmatpush3.bf16.msra.mxu0 %v1682_v5 }
 0x231   :  { %1175 = vmatprep.subr.bf16.mxu0 %v1577_v0 }
 0x234   :  { %1176 = vmatpush3.bf16.msra.mxu0 %v1688_v6 }
 0x235   :  { %1177 = vmatprep.subr.bf16.mxu0 %v1577_v0 }
 0x238   :  { %1178 = vmatpush3.bf16.msra.mxu0 %v1694_v7 }
 0x239   :  { %1179 = vmatprep.subr.bf16.mxu0 %v1577_v0 }
 0x23c   :  { %1180 = vmatpush3.bf16.msra.mxu0 %v1700_v8 }
 0x23d   :  { %1205 = vmatprep.subr.bf16.mxu0 %v1577_v0 }
 0x2f2   :  { %v261_v30 = vpop.f32.mrb[4].mxu0 }
 0x2f3   :  { %v267_v31 = vadd.f32 %v261_v30, %v226_v29  ;;  %v1143_v32 = vpop.f32.mrb[5].mxu0 }
 0x2f4   :  { %v264_v33 = vpop.f32.mrb[6].mxu0 }
 0x2f5   :  { %1426 = vtanh.f32 %v267_v31  ;;  %v1144_v34 = vpop.f32.mrb[7].mxu0  ;;  %v562_v33 = vunpack.c.h.bf16 %v513_v24 }
 0x2ff   :  { %v1427_v35 = vpop.eup %1426 }
 0x300   :  { %v269_v36 = vpack.c.bf16 %v1427_v35, %v1427_v35 }
 0x302   :  { %271 = vst [vmem:[#allocation9 + $0x8] sm:$0xf] %v269_v36  ;;  %1162 = vmatmul.mubr.bf16.vlgmr.msra.gmra.mrb[4].mxu1 %v269_v36 }
 0x303   :  { %1186 = vmatpush3.bf16.msra.mxu1 %v1661_v1  ;;  %1201 = vmatprep.mubr.msk.bf16.mxu1 %vm1578_vm0, %v1577_v0 }
 0x304   :  { %1187 = vmatprep.subr.bf16.mxu1 %v1577_v0 }
 0x307   :  { %1188 = vmatpush3.bf16.msra.mxu1 %v1664_v2 }
 0x308   :  { %1189 = vmatprep.subr.bf16.mxu1 %v1577_v0 }
 0x30b   :  { %1190 = vmatpush3.bf16.msra.mxu1 %v1670_v3 }
 0x30c   :  { %1191 = vmatprep.subr.bf16.mxu1 %v1577_v0 }
 0x30f   :  { %1192 = vmatpush3.bf16.msra.mxu1 %v1676_v4 }
 0x310   :  { %1193 = vmatprep.subr.bf16.mxu1 %v1577_v0 }
 0x313   :  { %1194 = vmatpush3.bf16.msra.mxu1 %v1682_v5 }
 0x314   :  { %1195 = vmatprep.subr.bf16.mxu1 %v1577_v0 }
 0x317   :  { %1196 = vmatpush3.bf16.msra.mxu1 %v1688_v6 }
 0x318   :  { %1197 = vmatprep.subr.bf16.mxu1 %v1577_v0 }
 0x31b   :  { %1198 = vmatpush3.bf16.msra.mxu1 %v1694_v7 }
 0x31c   :  { %1199 = vmatprep.subr.bf16.mxu1 %v1577_v0 }
 0x31f   :  { %1200 = vmatpush3.bf16.msra.mxu1 %v1700_v8 }
 0x320   :  { %1225 = vmatprep.subr.bf16.mxu1 %v1577_v0 }
 0x3d5   :  { %v309_v38 = vpop.f32.mrb[4].mxu1 }
 0x3d6   :  { %v315_v39 = vadd.f32 %v309_v38, %v274_v37  ;;  %v1163_v40 = vpop.f32.mrb[5].mxu1 }
 0x3d7   :  { %v312_v41 = vpop.f32.mrb[6].mxu1 }
 0x3d8   :  { %1428 = vtanh.f32 %v315_v39  ;;  %v1164_v42 = vpop.f32.mrb[7].mxu1  ;;  %v609_v41 = vld [vmem:[#allocation3 + $0x28] sm:$0xff]  }
 0x3d9   :  { %v610_v42 = vunpack.c.l.bf16 %v609_v41 }
 0x3e2   :  { %v1429_v43 = vpop.eup %1428 }
 0x3e3   :  { %v317_v44 = vpack.c.bf16 %v1429_v43, %v1429_v43 }
 0x3e5   :  { %319 = vst [vmem:[#allocation9 + $0xc] sm:$0xf] %v317_v44  ;;  %1182 = vmatmul.mubr.bf16.vlgmr.msra.gmra.mrb[8].mxu0 %v317_v44 }
 0x3e6   :  { %1206 = vmatpush3.bf16.msra.mxu0 %v1661_v1  ;;  %1221 = vmatprep.mubr.msk.bf16.mxu0 %vm1578_vm0, %v1577_v0 }
 0x3e7   :  { %1207 = vmatprep.subr.bf16.mxu0 %v1577_v0 }
 0x3ea   :  { %1208 = vmatpush3.bf16.msra.mxu0 %v1664_v2 }
 0x3eb   :  { %1209 = vmatprep.subr.bf16.mxu0 %v1577_v0 }
 0x3ee   :  { %1210 = vmatpush3.bf16.msra.mxu0 %v1670_v3 }
 0x3ef   :  { %1211 = vmatprep.subr.bf16.mxu0 %v1577_v0 }
 0x3f2   :  { %1212 = vmatpush3.bf16.msra.mxu0 %v1676_v4 }
 0x3f3   :  { %1213 = vmatprep.subr.bf16.mxu0 %v1577_v0 }
 0x3f6   :  { %1214 = vmatpush3.bf16.msra.mxu0 %v1682_v5 }
 0x3f7   :  { %1215 = vmatprep.subr.bf16.mxu0 %v1577_v0 }
 0x3fa   :  { %1216 = vmatpush3.bf16.msra.mxu0 %v1688_v6 }
 0x3fb   :  { %1217 = vmatprep.subr.bf16.mxu0 %v1577_v0 }
 0x3fe   :  { %1218 = vmatpush3.bf16.msra.mxu0 %v1694_v7 }
 0x3ff   :  { %1219 = vmatprep.subr.bf16.mxu0 %v1577_v0 }
 0x402   :  { %1220 = vmatpush3.bf16.msra.mxu0 %v1700_v8 }
 0x403   :  { %1245 = vmatprep.subr.bf16.mxu0 %v1577_v0 }
 0x4b8   :  { %v357_v47 = vpop.f32.mrb[8].mxu0 }
 0x4b9   :  { %v363_v48 = vadd.f32 %v357_v47, %v322_v46  ;;  %v1183_v49 = vpop.f32.mrb[9].mxu0 }
 0x4ba   :  { %v360_v50 = vpop.f32.mrb[10].mxu0 }
 0x4bb   :  { %1430 = vtanh.f32 %v363_v48  ;;  %v1184_v51 = vpop.f32.mrb[11].mxu0  ;;  %v658_v50 = vunpack.c.h.bf16 %v609_v41 }
 0x4c5   :  { %v1431_v52 = vpop.eup %1430 }
 0x4c6   :  { %v365_v53 = vpack.c.bf16 %v1431_v52, %v1431_v52 }
 0x4c8   :  { %367 = vst [vmem:[#allocation9 + $0x10] sm:$0xf] %v365_v53  ;;  %1202 = vmatmul.mubr.bf16.vlgmr.msra.gmra.mrb[8].mxu1 %v365_v53 }
 0x4c9   :  { %1226 = vmatpush3.bf16.msra.mxu1 %v1661_v1  ;;  %1241 = vmatprep.mubr.msk.bf16.mxu1 %vm1578_vm0, %v1577_v0 }
 0x4ca   :  { %1227 = vmatprep.subr.bf16.mxu1 %v1577_v0 }
 0x4cd   :  { %1228 = vmatpush3.bf16.msra.mxu1 %v1664_v2 }
 0x4ce   :  { %1229 = vmatprep.subr.bf16.mxu1 %v1577_v0 }
 0x4d1   :  { %1230 = vmatpush3.bf16.msra.mxu1 %v1670_v3 }
 0x4d2   :  { %1231 = vmatprep.subr.bf16.mxu1 %v1577_v0 }
 0x4d5   :  { %1232 = vmatpush3.bf16.msra.mxu1 %v1676_v4 }
 0x4d6   :  { %1233 = vmatprep.subr.bf16.mxu1 %v1577_v0 }
 0x4d9   :  { %1234 = vmatpush3.bf16.msra.mxu1 %v1682_v5 }
 0x4da   :  { %1235 = vmatprep.subr.bf16.mxu1 %v1577_v0 }
 0x4dd   :  { %1236 = vmatpush3.bf16.msra.mxu1 %v1688_v6 }
 0x4de   :  { %1237 = vmatprep.subr.bf16.mxu1 %v1577_v0 }
 0x4e1   :  { %1238 = vmatpush3.bf16.msra.mxu1 %v1694_v7 }
 0x4e2   :  { %1239 = vmatprep.subr.bf16.mxu1 %v1577_v0 }
 0x4e5   :  { %1240 = vmatpush3.bf16.msra.mxu1 %v1700_v8 }
 0x4e6   :  { %1265 = vmatprep.subr.bf16.mxu1 %v1577_v0 }
 0x59b   :  { %v405_v55 = vpop.f32.mrb[8].mxu1 }
 0x59c   :  { %v411_v56 = vadd.f32 %v405_v55, %v370_v54  ;;  %v1203_v57 = vpop.f32.mrb[9].mxu1 }
 0x59d   :  { %v408_v58 = vpop.f32.mrb[10].mxu1 }
 0x59e   :  { %1432 = vtanh.f32 %v411_v56  ;;  %v1204_v59 = vpop.f32.mrb[11].mxu1  ;;  %v705_v58 = vld [vmem:[#allocation3 + $0x30] sm:$0xff]  }
 0x59f   :  { %v706_v59 = vunpack.c.l.bf16 %v705_v58 }
 0x5a8   :  { %v1433_v60 = vpop.eup %1432 }
 0x5a9   :  { %v413_v61 = vpack.c.bf16 %v1433_v60, %v1433_v60 }
 0x5ab   :  { %415 = vst [vmem:[#allocation9 + $0x14] sm:$0xf] %v413_v61  ;;  %1222 = vmatmul.mubr.bf16.vlgmr.msra.gmra.mrb[12].mxu0 %v413_v61 }
 0x5ac   :  { %1246 = vmatpush3.bf16.msra.mxu0 %v1661_v1  ;;  %1261 = vmatprep.mubr.msk.bf16.mxu0 %vm1578_vm0, %v1577_v0 }
 0x5ad   :  { %1247 = vmatprep.subr.bf16.mxu0 %v1577_v0 }
 0x5b0   :  { %1248 = vmatpush3.bf16.msra.mxu0 %v1664_v2 }
 0x5b1   :  { %1249 = vmatprep.subr.bf16.mxu0 %v1577_v0 }
 0x5b4   :  { %1250 = vmatpush3.bf16.msra.mxu0 %v1670_v3 }
 0x5b5   :  { %1251 = vmatprep.subr.bf16.mxu0 %v1577_v0 }
 0x5b8   :  { %1252 = vmatpush3.bf16.msra.mxu0 %v1676_v4 }
 0x5b9   :  { %1253 = vmatprep.subr.bf16.mxu0 %v1577_v0 }
 0x5bc   :  { %1254 = vmatpush3.bf16.msra.mxu0 %v1682_v5 }
 0x5bd   :  { %1255 = vmatprep.subr.bf16.mxu0 %v1577_v0 }
 0x5c0   :  { %1256 = vmatpush3.bf16.msra.mxu0 %v1688_v6 }
 0x5c1   :  { %1257 = vmatprep.subr.bf16.mxu0 %v1577_v0 }
 0x5c4   :  { %1258 = vmatpush3.bf16.msra.mxu0 %v1694_v7 }
 0x5c5   :  { %1259 = vmatprep.subr.bf16.mxu0 %v1577_v0 }
 0x5c8   :  { %1260 = vmatpush3.bf16.msra.mxu0 %v1700_v8 }
 0x5c9   :  { %1285 = vmatprep.subr.bf16.mxu0 %v1577_v0 }
 0x67e   :  { %v453_v9 = vpop.f32.mrb[12].mxu0 }
 0x67f   :  { %v459_v10 = vadd.f32 %v453_v9, %v418_v63  ;;  %v1223_v11 = vpop.f32.mrb[13].mxu0 }
 0x680   :  { %v456_v12 = vpop.f32.mrb[14].mxu0 }
 0x681   :  { %1434 = vtanh.f32 %v459_v10  ;;  %v1224_v13 = vpop.f32.mrb[15].mxu0 }
 0x68b   :  { %v1435_v14 = vpop.eup %1434 }
 0x68c   :  { %v461_v15 = vpack.c.bf16 %v1435_v14, %v1435_v14 }
 0x68e   :  { %463 = vst [vmem:[#allocation9 + $0x18] sm:$0xf] %v461_v15  ;;  %1242 = vmatmul.mubr.bf16.vlgmr.msra.gmra.mrb[12].mxu1 %v461_v15 }
 0x68f   :  { %1266 = vmatpush3.bf16.msra.mxu1 %v1661_v1  ;;  %1281 = vmatprep.mubr.msk.bf16.mxu1 %vm1578_vm0, %v1577_v0 }
 0x690   :  { %1267 = vmatprep.subr.bf16.mxu1 %v1577_v0 }
 0x693   :  { %1268 = vmatpush3.bf16.msra.mxu1 %v1664_v2 }
 0x694   :  { %1269 = vmatprep.subr.bf16.mxu1 %v1577_v0 }
 0x697   :  { %1270 = vmatpush3.bf16.msra.mxu1 %v1670_v3 }
 0x698   :  { %1271 = vmatprep.subr.bf16.mxu1 %v1577_v0 }
 0x69b   :  { %1272 = vmatpush3.bf16.msra.mxu1 %v1676_v4 }
 0x69c   :  { %1273 = vmatprep.subr.bf16.mxu1 %v1577_v0 }
 0x69f   :  { %1274 = vmatpush3.bf16.msra.mxu1 %v1682_v5 }
 0x6a0   :  { %1275 = vmatprep.subr.bf16.mxu1 %v1577_v0 }
 0x6a3   :  { %1276 = vmatpush3.bf16.msra.mxu1 %v1688_v6 }
 0x6a4   :  { %1277 = vmatprep.subr.bf16.mxu1 %v1577_v0 }
 0x6a7   :  { %1278 = vmatpush3.bf16.msra.mxu1 %v1694_v7 }
 0x6a8   :  { %1279 = vmatprep.subr.bf16.mxu1 %v1577_v0 }
 0x6ab   :  { %1280 = vmatpush3.bf16.msra.mxu1 %v1700_v8 }
 0x6ac   :  { %1305 = vmatprep.subr.bf16.mxu1 %v1577_v0 }
 0x761   :  { %v501_v17 = vpop.f32.mrb[12].mxu1 }
 0x762   :  { %v507_v18 = vadd.f32 %v501_v17, %v466_v16  ;;  %v1243_v19 = vpop.f32.mrb[13].mxu1 }
 0x763   :  { %v504_v20 = vpop.f32.mrb[14].mxu1 }
 0x764   :  { %1436 = vtanh.f32 %v507_v18  ;;  %v1244_v21 = vpop.f32.mrb[15].mxu1 }
 0x76e   :  { %v1437_v22 = vpop.eup %1436 }
 0x76f   :  { %v509_v23 = vpack.c.bf16 %v1437_v22, %v1437_v22 }
 0x771   :  { %511 = vst [vmem:[#allocation9 + $0x1c] sm:$0xf] %v509_v23  ;;  %1262 = vmatmul.mubr.bf16.vlgmr.msra.gmra.mrb[16].mxu0 %v509_v23 }
 0x772   :  { %1286 = vmatpush3.bf16.msra.mxu0 %v1661_v1  ;;  %1301 = vmatprep.mubr.msk.bf16.mxu0 %vm1578_vm0, %v1577_v0 }
 0x773   :  { %1287 = vmatprep.subr.bf16.mxu0 %v1577_v0 }
 0x776   :  { %1288 = vmatpush3.bf16.msra.mxu0 %v1664_v2 }
 0x777   :  { %1289 = vmatprep.subr.bf16.mxu0 %v1577_v0 }
 0x77a   :  { %1290 = vmatpush3.bf16.msra.mxu0 %v1670_v3 }
 0x77b   :  { %1291 = vmatprep.subr.bf16.mxu0 %v1577_v0 }
 0x77e   :  { %1292 = vmatpush3.bf16.msra.mxu0 %v1676_v4 }
 0x77f   :  { %1293 = vmatprep.subr.bf16.mxu0 %v1577_v0 }
 0x782   :  { %1294 = vmatpush3.bf16.msra.mxu0 %v1682_v5 }
 0x783   :  { %1295 = vmatprep.subr.bf16.mxu0 %v1577_v0 }
 0x786   :  { %1296 = vmatpush3.bf16.msra.mxu0 %v1688_v6 }
 0x787   :  { %1297 = vmatprep.subr.bf16.mxu0 %v1577_v0 }
 0x78a   :  { %1298 = vmatpush3.bf16.msra.mxu0 %v1694_v7 }
 0x78b   :  { %1299 = vmatprep.subr.bf16.mxu0 %v1577_v0 }
 0x78e   :  { %1300 = vmatpush3.bf16.msra.mxu0 %v1700_v8 }
 0x78f   :  { %1325 = vmatprep.subr.bf16.mxu0 %v1577_v0 }
 0x844   :  { %v549_v26 = vpop.f32.mrb[16].mxu0 }
 0x845   :  { %v555_v27 = vadd.f32 %v549_v26, %v514_v25  ;;  %v1263_v28 = vpop.f32.mrb[17].mxu0 }
 0x846   :  { %v552_v29 = vpop.f32.mrb[18].mxu0 }
 0x847   :  { %1438 = vtanh.f32 %v555_v27  ;;  %v1264_v30 = vpop.f32.mrb[19].mxu0 }
 0x851   :  { %v1439_v31 = vpop.eup %1438 }
 0x852   :  { %v557_v32 = vpack.c.bf16 %v1439_v31, %v1439_v31 }
 0x854   :  { %559 = vst [vmem:[#allocation9 + $0x20] sm:$0xf] %v557_v32  ;;  %1282 = vmatmul.mubr.bf16.vlgmr.msra.gmra.mrb[16].mxu1 %v557_v32 }
 0x855   :  { %1306 = vmatpush3.bf16.msra.mxu1 %v1661_v1  ;;  %1321 = vmatprep.mubr.msk.bf16.mxu1 %vm1578_vm0, %v1577_v0 }
 0x856   :  { %1307 = vmatprep.subr.bf16.mxu1 %v1577_v0 }
 0x859   :  { %1308 = vmatpush3.bf16.msra.mxu1 %v1664_v2 }
 0x85a   :  { %1309 = vmatprep.subr.bf16.mxu1 %v1577_v0 }
 0x85d   :  { %1310 = vmatpush3.bf16.msra.mxu1 %v1670_v3 }
 0x85e   :  { %1311 = vmatprep.subr.bf16.mxu1 %v1577_v0 }
 0x861   :  { %1312 = vmatpush3.bf16.msra.mxu1 %v1676_v4 }
 0x862   :  { %1313 = vmatprep.subr.bf16.mxu1 %v1577_v0 }
 0x865   :  { %1314 = vmatpush3.bf16.msra.mxu1 %v1682_v5 }
 0x866   :  { %1315 = vmatprep.subr.bf16.mxu1 %v1577_v0 }
 0x869   :  { %1316 = vmatpush3.bf16.msra.mxu1 %v1688_v6 }
 0x86a   :  { %1317 = vmatprep.subr.bf16.mxu1 %v1577_v0 }
 0x86d   :  { %1318 = vmatpush3.bf16.msra.mxu1 %v1694_v7 }
 0x86e   :  { %1319 = vmatprep.subr.bf16.mxu1 %v1577_v0 }
 0x871   :  { %1320 = vmatpush3.bf16.msra.mxu1 %v1700_v8 }
 0x872   :  { %1345 = vmatprep.subr.bf16.mxu1 %v1577_v0 }
 0x927   :  { %v597_v34 = vpop.f32.mrb[16].mxu1 }
 0x928   :  { %v603_v35 = vadd.f32 %v597_v34, %v562_v33  ;;  %v1283_v36 = vpop.f32.mrb[17].mxu1 }
 0x929   :  { %v600_v37 = vpop.f32.mrb[18].mxu1 }
 0x92a   :  { %1440 = vtanh.f32 %v603_v35  ;;  %v1284_v38 = vpop.f32.mrb[19].mxu1 }
 0x934   :  { %v1441_v39 = vpop.eup %1440 }
 0x935   :  { %v605_v40 = vpack.c.bf16 %v1441_v39, %v1441_v39 }
 0x937   :  { %607 = vst [vmem:[#allocation9 + $0x24] sm:$0xf] %v605_v40  ;;  %1302 = vmatmul.mubr.bf16.vlgmr.msra.gmra.mrb[20].mxu0 %v605_v40 }
 0x938   :  { %1326 = vmatpush3.bf16.msra.mxu0 %v1661_v1  ;;  %1341 = vmatprep.mubr.msk.bf16.mxu0 %vm1578_vm0, %v1577_v0 }
 0x939   :  { %1327 = vmatprep.subr.bf16.mxu0 %v1577_v0 }
 0x93c   :  { %1328 = vmatpush3.bf16.msra.mxu0 %v1664_v2 }
 0x93d   :  { %1329 = vmatprep.subr.bf16.mxu0 %v1577_v0 }
 0x940   :  { %1330 = vmatpush3.bf16.msra.mxu0 %v1670_v3 }
 0x941   :  { %1331 = vmatprep.subr.bf16.mxu0 %v1577_v0 }
 0x944   :  { %1332 = vmatpush3.bf16.msra.mxu0 %v1676_v4 }
 0x945   :  { %1333 = vmatprep.subr.bf16.mxu0 %v1577_v0 }
 0x948   :  { %1334 = vmatpush3.bf16.msra.mxu0 %v1682_v5 }
 0x949   :  { %1335 = vmatprep.subr.bf16.mxu0 %v1577_v0 }
 0x94c   :  { %1336 = vmatpush3.bf16.msra.mxu0 %v1688_v6 }
 0x94d   :  { %1337 = vmatprep.subr.bf16.mxu0 %v1577_v0 }
 0x950   :  { %1338 = vmatpush3.bf16.msra.mxu0 %v1694_v7 }
 0x951   :  { %1339 = vmatprep.subr.bf16.mxu0 %v1577_v0 }
 0x954   :  { %1340 = vmatpush3.bf16.msra.mxu0 %v1700_v8 }
 0x955   :  { %1365 = vmatprep.subr.bf16.mxu0 %v1577_v0 }
 0xa0a   :  { %v645_v43 = vpop.f32.mrb[20].mxu0 }
 0xa0b   :  { %v651_v44 = vadd.f32 %v645_v43, %v610_v42  ;;  %v1303_v45 = vpop.f32.mrb[21].mxu0 }
 0xa0c   :  { %v648_v46 = vpop.f32.mrb[22].mxu0 }
 0xa0d   :  { %1442 = vtanh.f32 %v651_v44  ;;  %v1304_v47 = vpop.f32.mrb[23].mxu0 }
 0xa17   :  { %v1443_v48 = vpop.eup %1442 }
 0xa18   :  { %v653_v49 = vpack.c.bf16 %v1443_v48, %v1443_v48 }
 0xa1a   :  { %655 = vst [vmem:[#allocation9 + $0x28] sm:$0xf] %v653_v49  ;;  %1322 = vmatmul.mubr.bf16.vlgmr.msra.gmra.mrb[20].mxu1 %v653_v49 }
 0xa1b   :  { %1346 = vmatpush3.bf16.msra.mxu1 %v1661_v1  ;;  %1361 = vmatprep.mubr.msk.bf16.mxu1 %vm1578_vm0, %v1577_v0 }
 0xa1c   :  { %1347 = vmatprep.subr.bf16.mxu1 %v1577_v0 }
 0xa1f   :  { %1348 = vmatpush3.bf16.msra.mxu1 %v1664_v2 }
 0xa20   :  { %1349 = vmatprep.subr.bf16.mxu1 %v1577_v0 }
 0xa23   :  { %1350 = vmatpush3.bf16.msra.mxu1 %v1670_v3 }
 0xa24   :  { %1351 = vmatprep.subr.bf16.mxu1 %v1577_v0 }
 0xa27   :  { %1352 = vmatpush3.bf16.msra.mxu1 %v1676_v4 }
 0xa28   :  { %1353 = vmatprep.subr.bf16.mxu1 %v1577_v0 }
 0xa2b   :  { %1354 = vmatpush3.bf16.msra.mxu1 %v1682_v5 }
 0xa2c   :  { %1355 = vmatprep.subr.bf16.mxu1 %v1577_v0 }
 0xa2f   :  { %1356 = vmatpush3.bf16.msra.mxu1 %v1688_v6 }
 0xa30   :  { %1357 = vmatprep.subr.bf16.mxu1 %v1577_v0 }
 0xa33   :  { %1358 = vmatpush3.bf16.msra.mxu1 %v1694_v7 }
 0xa34   :  { %1359 = vmatprep.subr.bf16.mxu1 %v1577_v0 }
 0xa37   :  { %1360 = vmatpush3.bf16.msra.mxu1 %v1700_v8 }
 0xa38   :  { %1385 = vmatprep.subr.bf16.mxu1 %v1577_v0 }
 0xaed   :  { %v693_v51 = vpop.f32.mrb[20].mxu1 }
 0xaee   :  { %v699_v52 = vadd.f32 %v693_v51, %v658_v50  ;;  %v1323_v53 = vpop.f32.mrb[21].mxu1 }
 0xaef   :  { %v696_v54 = vpop.f32.mrb[22].mxu1 }
 0xaf0   :  { %1444 = vtanh.f32 %v699_v52  ;;  %v1324_v55 = vpop.f32.mrb[23].mxu1 }
 0xafa   :  { %v1445_v56 = vpop.eup %1444 }
 0xafb   :  { %v701_v57 = vpack.c.bf16 %v1445_v56, %v1445_v56 }
 0xafd   :  { %703 = vst [vmem:[#allocation9 + $0x2c] sm:$0xf] %v701_v57  ;;  %1342 = vmatmul.mubr.bf16.vlgmr.msra.gmra.mrb[24].mxu0 %v701_v57 }
 0xafe   :  { %1366 = vmatpush3.bf16.msra.mxu0 %v1661_v1  ;;  %1381 = vmatprep.mubr.msk.bf16.mxu0 %vm1578_vm0, %v1577_v0 }
 0xaff   :  { %1367 = vmatprep.subr.bf16.mxu0 %v1577_v0 }
 0xb02   :  { %1368 = vmatpush3.bf16.msra.mxu0 %v1664_v2 }
 0xb03   :  { %1369 = vmatprep.subr.bf16.mxu0 %v1577_v0 }
 0xb06   :  { %1370 = vmatpush3.bf16.msra.mxu0 %v1670_v3 }
 0xb07   :  { %1371 = vmatprep.subr.bf16.mxu0 %v1577_v0 }
 0xb0a   :  { %1372 = vmatpush3.bf16.msra.mxu0 %v1676_v4 }
 0xb0b   :  { %1373 = vmatprep.subr.bf16.mxu0 %v1577_v0 }
 0xb0e   :  { %1374 = vmatpush3.bf16.msra.mxu0 %v1682_v5 }
 0xb0f   :  { %1375 = vmatprep.subr.bf16.mxu0 %v1577_v0 }
 0xb12   :  { %1376 = vmatpush3.bf16.msra.mxu0 %v1688_v6 }
 0xb13   :  { %1377 = vmatprep.subr.bf16.mxu0 %v1577_v0 }
 0xb16   :  { %1378 = vmatpush3.bf16.msra.mxu0 %v1694_v7 }
 0xb17   :  { %1379 = vmatprep.subr.bf16.mxu0 %v1577_v0 }
 0xb1a   :  { %1380 = vmatpush3.bf16.msra.mxu0 %v1700_v8 }
 0xbd0   :  { %v741_v60 = vpop.f32.mrb[24].mxu0 }
 0xbd1   :  { %v747_v61 = vadd.f32 %v741_v60, %v706_v59  ;;  %v1343_v62 = vpop.f32.mrb[25].mxu0 }
 0xbd2   :  { %v744_v63 = vpop.f32.mrb[26].mxu0 }
 0xbd3   :  { %1446 = vtanh.f32 %v747_v61  ;;  %v1344_v9 = vpop.f32.mrb[27].mxu0 }
 0xbdd   :  { %v1447_v10 = vpop.eup %1446 }
 0xbde   :  { %v749_v11 = vpack.c.bf16 %v1447_v10, %v1447_v10 }
 0xbe0   :  { %751 = vst [vmem:[#allocation9 + $0x30] sm:$0xf] %v749_v11  ;;  %1362 = vmatmul.mubr.bf16.vlgmr.msra.gmra.mrb[24].mxu1 %v749_v11 }
 0xbe1   :  { %1386 = vmatpush3.bf16.msra.mxu1 %v1661_v1  ;;  %1401 = vmatprep.mubr.msk.bf16.mxu1 %vm1578_vm0, %v1577_v0  ;;  %v754_v1 = vunpack.c.h.bf16 %v705_v58 }
 0xbe2   :  { %1387 = vmatprep.subr.bf16.mxu1 %v1577_v0 }
 0xbe5   :  { %1388 = vmatpush3.bf16.msra.mxu1 %v1664_v2 }
 0xbe6   :  { %1389 = vmatprep.subr.bf16.mxu1 %v1577_v0 }
 0xbe9   :  { %1390 = vmatpush3.bf16.msra.mxu1 %v1670_v3 }
 0xbea   :  { %1391 = vmatprep.subr.bf16.mxu1 %v1577_v0 }
 0xbed   :  { %1392 = vmatpush3.bf16.msra.mxu1 %v1676_v4 }
 0xbee   :  { %1393 = vmatprep.subr.bf16.mxu1 %v1577_v0 }
 0xbf1   :  { %1394 = vmatpush3.bf16.msra.mxu1 %v1682_v5 }
 0xbf2   :  { %1395 = vmatprep.subr.bf16.mxu1 %v1577_v0 }
 0xbf5   :  { %1396 = vmatpush3.bf16.msra.mxu1 %v1688_v6  ;;  %v801_v6 = vld [vmem:[#allocation3 + $0x38] sm:$0xff]  }
 0xbf6   :  { %1397 = vmatprep.subr.bf16.mxu1 %v1577_v0  ;;  %v802_v15 = vunpack.c.l.bf16 %v801_v6  ;;  %v850_v20 = vunpack.c.h.bf16 %v801_v6 }
 0xbf9   :  { %1398 = vmatpush3.bf16.msra.mxu1 %v1694_v7 }
 0xbfa   :  { %1399 = vmatprep.subr.bf16.mxu1 %v1577_v0 }
 0xbfd   :  { %1400 = vmatpush3.bf16.msra.mxu1 %v1700_v8 }
 0xcb3   :  { %v789_v2 = vpop.f32.mrb[24].mxu1 }
 0xcb4   :  { %v795_v3 = vadd.f32 %v789_v2, %v754_v1  ;;  %v1363_v4 = vpop.f32.mrb[25].mxu1 }
 0xcb5   :  { %v792_v12 = vpop.f32.mrb[26].mxu1 }
 0xcb6   :  { %1448 = vtanh.f32 %v795_v3  ;;  %v1364_v13 = vpop.f32.mrb[27].mxu1 }
 0xcc0   :  { %v1449_v5 = vpop.eup %1448 }
 0xcc1   :  { %v797_v14 = vpack.c.bf16 %v1449_v5, %v1449_v5 }
 0xcc3   :  { %799 = vst [vmem:[#allocation9 + $0x34] sm:$0xf] %v797_v14  ;;  %1382 = vmatmul.mubr.bf16.vlgmr.msra.gmra.mrb[28].mxu0 %v797_v14 }
 0xd96   :  { %v837_v16 = vpop.f32.mrb[28].mxu0 }
 0xd97   :  { %v843_v17 = vadd.f32 %v837_v16, %v802_v15  ;;  %v1383_v7 = vpop.f32.mrb[29].mxu0 }
 0xd98   :  { %v840_v18 = vpop.f32.mrb[30].mxu0 }
 0xd99   :  { %1450 = vtanh.f32 %v843_v17  ;;  %v1384_v0 = vpop.f32.mrb[31].mxu0 }
 0xda3   :  { %v1451_v8 = vpop.eup %1450 }
 0xda4   :  { %v845_v19 = vpack.c.bf16 %v1451_v8, %v1451_v8 }
 0xda6   :  { %847 = vst [vmem:[#allocation9 + $0x38] sm:$0xf] %v845_v19  ;;  %1402 = vmatmul.mubr.bf16.vlgmr.msra.gmra.mrb[28].mxu1 %v845_v19 }
 0xe79   :  { %v885_v21 = vpop.f32.mrb[28].mxu1 }
 0xe7a   :  { %v891_v22 = vadd.f32 %v885_v21, %v850_v20  ;;  %v1403_v23 = vpop.f32.mrb[29].mxu1 }
 0xe7b   :  { %v888_v24 = vpop.f32.mrb[30].mxu1 }
 0xe7c   :  { %1452 = vtanh.f32 %v891_v22  ;;  %v1404_v25 = vpop.f32.mrb[31].mxu1 }
 0xe86   :  { %v1453_v26 = vpop.eup %1452 }
 0xe87   :  { %v893_v27 = vpack.c.bf16 %v1453_v26, %v1453_v26  ;;  %900 = vst [vmem:[#allocation10] sm:$0xff] %v1453_v26 }
 0xe88   :  { %1531 = shalt.err (!%p1528_p0)
}
 0xe89   :  { %s1532_s7 = scalar_lea.hbm %s1997_s4, 128 }
 0xe8a   :  { %p1533_p1 = scmp.ne.s32.totalorder %s1997_s4, %s1532_s7  ;;  %p1536_p2 = scmp.lt.u32.totalorder %s1532_s7, %s1997_s4 }
 0xe8c   :  { %p1538_p3 = pnand %p1536_p2, %p1533_p1 }
 0xe8e   :  { %1541 = shalt.err (!%p1538_p3)
}
 0xe8f   :  { %922 = dma.vmem_to_hbm [thread:$0]  %s920_s25, 128, %s1997_s4, [#allocation11]   ;;  %895 = vst [vmem:[#allocation9 + $0x3c] sm:$0xf] %v893_v27 }
 0xe90   :  { %s1542_s13 = scalar_lea.vmem %s1959_s29, 1024  ;;  %p1547_p5 = scmp.lt.s32.totalorder %s1959_s29, %s1959_s29 }
 0xe91   :  { %p1543_p4 = scmp.ne.s32.totalorder %s1959_s29, %s1542_s13  ;;  %p1548_p6 = scmp.lt.s32.totalorder %s1542_s13, %s1542_s13 }
 0xe93   :  { %p1549_p7 = por %p1548_p6, %p1547_p5 }
 0xe95   :  { %p1550_p8 = pnand %p1549_p7, %p1543_p4 }
 0xe97   :  { %1553 = shalt.err (!%p1550_p8)
}
 0xe98   :  { %s1554_s16 = scalar_lea.hbm %s1996_s3, 1024 }
 0xe99   :  { %p1555_p9 = scmp.ne.s32.totalorder %s1996_s3, %s1554_s16  ;;  %p1558_p10 = scmp.lt.u32.totalorder %s1554_s16, %s1996_s3 }
 0xe9b   :  { %p1560_p11 = pnand %p1558_p10, %p1555_p9 }
 0xe9d   :  { %1563 = shalt.err (!%p1560_p11)
}
 0xe9e   :  { %912 = dma.vmem_to_hbm [thread:$0]  %s1959_s29, 1024, %s1996_s3, [#allocation5], %s1574_s27, %s1574_s27, %s1575_s28  }
 0xe9f   :  { %1568 = dma.done.wait [#allocation5], 1024  }
 0xea0   :  { %1569 = vsyncadd [#allocation5], 4294966272 }
 0xea1   :  { %1570 = dma.done.wait [#allocation11], 128  }
 0xea2   :  { %1571 = vsyncadd [#allocation11], 4294967168 }
 0xea3   :  { %929 = vsyncpa [#allocation4], 1 }
 0xea4   :  { %930 = vsyncpa [#allocation7], 1 }
 0xea5   :  { %931 = vsyncpa [#allocation5], 1 }
 0xea6   :  { %932 = vsyncpa [#allocation11], 1 }

</bundles_post_ra>
